<compile_context>
chip_gen: v5e
topology: v5e:2x2
jax: 0.10.0
libtpu: 0.0.40
codegen_flags: <defaults>
</compile_context>

<pallas_src>
import jax
import jax.numpy as jnp
from jax.experimental import pallas as pl
from jax.experimental.pallas import tpu as pltpu

# ---- static hyper-parameters (mirror `args` of the PyTorch module) ----
B = 2
N = 8                       # args.nodes
LOOK_BACK = 12              # forced by prc.repeat(1, 1, 12)
KCNN = 3                    # args.kcnn
SEQ = LOOK_BACK - KCNN + 1  # 10
BND = B * N                 # 16
NGRU = 24                   # 2 layers x 12 scalars (w_ir,w_iz,w_in,w_hr,w_hz,w_hn,b_*)
NSMEM = 3 + SEQ             # conv_b, prc_gain, fc_b, fc_w[0:SEQ]

SMEM_SPEC = pl.BlockSpec(memory_space=pltpu.MemorySpace.SMEM)
VMEM_SPEC = pl.BlockSpec(memory_space=pltpu.MemorySpace.VMEM)


# --------------------------------------------------------------------------------------
# Single fused kernel: conv2d -> GCN -> residual average -> wavefronted 2-layer GRU -> fc.
# Time-major layout: rows = time, columns = the b*N torch rows (b-major).
# --------------------------------------------------------------------------------------
def tgcn_kernel(smem_ref,                                        # SMEM scalars (13,)
                occ_ref, prc_ref, cmat_ref, adjT_ref, gcnwb_ref, gru_ref,   # VMEM
                out_ref):
    conv_b = smem_ref[0]
    prc_gain = smem_ref[1]
    fc_b = smem_ref[2]
    fcw = [smem_ref[3 + t] for t in range(SEQ)]                  # hoisted scalar loads

    # ---- Conv2d(1,1,(KCNN,2)): occ channel as a banded matmul (MXU, no misaligned
    #      sublane slices); prc channel is time-constant -> one scalar gain. -----------
    fea = jnp.dot(cmat_ref[...], occ_ref[...], preferred_element_type=jnp.float32)
    fea = fea + prc_gain * prc_ref[...] + conv_b                 # (SEQ, BND)

    # ---- GCN3: block-diagonal kron(I_B, adj)^T fold + Linear(seq,seq), bf16 MXU ops ---
    # TODO(synk): the block-diag adjacency is O((B*N)^2); grid/loop over batch before
    # scaling to the real SZ247 graph or large batches (VMEM budget).
    y1 = jnp.dot(fea.astype(jnp.bfloat16), adjT_ref[...].astype(jnp.bfloat16),
                 preferred_element_type=jnp.float32)             # (SEQ, BND)
    z = jnp.dot(gcnwb_ref[:, :SEQ].astype(jnp.bfloat16), y1.astype(jnp.bfloat16),
                preferred_element_type=jnp.float32)
    z = z + gcnwb_ref[:, SEQ:SEQ + 1]                            # bias column
    x = (z + fea) * 0.5                                          # (SEQ, BND)

    # ---- packed GRU gate coefficients: pre-broadcast per-sublane slabs (hoisted) ------
    G = gru_ref[...]                                             # (4, 7*BND)
    wi_rz = G[:, 0 * BND:1 * BND]                                # rows: [ir1,ir2,iz1,iz2]
    wh_rz = G[:, 1 * BND:2 * BND]                                # rows: [hr1,hr2,hz1,hz2]
    b_rz = G[:, 2 * BND:3 * BND]                                 # b_i + b_h, same order
    w_in = G[0:2, 3 * BND:4 * BND]                               # (2, BND): [l1, l2]
    w_hn = G[0:2, 4 * BND:5 * BND]
    b_in = G[0:2, 5 * BND:6 * BND]
    b_hn = G[0:2, 6 * BND:7 * BND]

    def sigmoid(v):                    # exact: sigma(v) = 0.5*tanh(v/2)+0.5, stays on EUP
        return 0.5 * jnp.tanh(0.5 * v) + 0.5

    # ---- wavefronted 2-layer GRU + fused Linear(seq, 1) -------------------------------
    # Wave step s: layer-1 consumes x[s] (state h1[s-1]); layer-2 consumes h1[s-1]
    # (state h2[s-2]).  Both layers share every packed op and every EUP push.
    H = jnp.zeros((2, BND), jnp.float32)                         # row0 = h1, row1 = h2
    y = jnp.zeros((1, BND), jnp.float32) + fc_b

    for s in range(SEQ + 1):                                     # static unroll, 11 steps
        xi = min(s, SEQ - 1)                                     # s==SEQ: row is discarded
        xs = x[xi:xi + 1, :]                                     # (1, BND)
        X = jnp.concatenate([xs, H[0:1, :]], axis=0)             # [x_s ; h1_{s-1}] (2,BND)
        X4 = jnp.concatenate([X, X], axis=0)                     # (4, BND)
        H4 = jnp.concatenate([H, H], axis=0)                     # (4, BND)
        rz = sigmoid(wi_rz * X4 + wh_rz * H4 + b_rz)             # r & z, both layers: 1 push
        r, zg = rz[0:2, :], rz[2:4, :]
        n = jnp.tanh(w_in * X + b_in + r * (w_hn * H + b_hn))    # 1 push
        H = n + zg * (H - n)                                     # == (1-z)*n + z*h
        if s == 0:
            # layer-2 has not consumed a real input yet: restore its zero initial state.
            H = jnp.concatenate([H[0:1, :], jnp.zeros((1, BND), jnp.float32)], axis=0)
        else:
            y = y + fcw[s - 1] * H[1:2, :]                       # fc(seq->1) folded in

    out_ref[...] = y                                             # single (1, BND) store


# --------------------------------------------------------------------------------------
# Host-side packing (call once; keeps the per-call path to layout-only work).
# --------------------------------------------------------------------------------------
def prepare_packed(params):
    cw = params['conv_w']
    cmat = jnp.zeros((SEQ, LOOK_BACK), jnp.float32)
    rows = jnp.arange(SEQ)
    for k in range(KCNN):
        cmat = cmat.at[rows, rows + k].set(cw[2 * k])            # occ taps, banded
    prc_gain = cw[1] + cw[3] + cw[5]                             # prc taps collapse

    g = params['gru']
    g1, g2 = g[:12], g[12:]

    def col2(i):
        return jnp.stack([g1[i], g2[i]]).reshape(2, 1)

    def col4(i, j):
        return jnp.concatenate([col2(i), col2(j)], axis=0)

    ones4 = jnp.ones((4, BND), jnp.float32)
    ones2 = jnp.ones((2, BND), jnp.float32)
    pad2 = jnp.zeros((2, BND), jnp.float32)
    wi_rz = col4(0, 1) * ones4                                   # [w_ir1,w_ir2,w_iz1,w_iz2]
    wh_rz = col4(3, 4) * ones4                                   # [w_hr1,w_hr2,w_hz1,w_hz2]
    b_rz = (col4(6, 7) + col4(9, 10)) * ones4                    # b_i + b_h
    w_in = col2(2) * ones2
    w_hn = col2(5) * ones2
    b_in = col2(8) * ones2
    b_hn = col2(11) * ones2
    gruB = jnp.concatenate(
        [wi_rz, wh_rz, b_rz,
         jnp.concatenate([w_in, pad2], axis=0),
         jnp.concatenate([w_hn, pad2], axis=0),
         jnp.concatenate([b_in, pad2], axis=0),
         jnp.concatenate([b_hn, pad2], axis=0)], axis=1)         # (4, 7*BND)

    smem = jnp.concatenate([params['conv_b'], prc_gain[None], params['fc_b'],
                            params['fc_w']]).astype(jnp.float32)  # (13,)
    gcn_wb = jnp.concatenate([params['gcn_w'], params['gcn_b_col']], axis=1)  # (SEQ, SEQ+1)
    return {'smem': smem, 'cmat': cmat, 'adjT_bd': params['adjT_bd'],
            'gcn_wb': gcn_wb, 'gruB': gruB}


def run_tgcn(packed, occ, prc_l):
    # Glue = layout only: time-major transpose; prc stays a single (1, BND) row.
    occ_T = jnp.transpose(occ, (1, 0, 2)).reshape(LOOK_BACK, BND).astype(jnp.float32)
    prc_row = prc_l.reshape(1, BND).astype(jnp.float32)
    y = pl.pallas_call(
        tgcn_kernel,
        out_shape=jax.ShapeDtypeStruct((1, BND), jnp.float32),
        in_specs=[SMEM_SPEC] + [VMEM_SPEC] * 6,
        out_specs=VMEM_SPEC,
    )(packed['smem'], occ_T, prc_row, packed['cmat'], packed['adjT_bd'],
      packed['gcn_wb'], packed['gruB'])
    return y.reshape(B, N)


forward = jax.jit(run_tgcn)


# --------------------------------------------------------------------------------------
# Pure-JAX reference (mirrors the torch forward exactly) for a correctness check.
# --------------------------------------------------------------------------------------
def forward_ref(params, occ, prc_l):
    occ_p = jnp.transpose(occ, (0, 2, 1)).reshape(BND, LOOK_BACK)
    prc = jnp.repeat(prc_l.reshape(BND, 1), LOOK_BACK, axis=1)
    w = params['conv_w'].reshape(KCNN, 2)
    fea = params['conv_b'][0] + sum(
        w[k, 0] * occ_p[:, k:k + SEQ] + w[k, 1] * prc[:, k:k + SEQ] for k in range(KCNN))
    adj_bd = params['adjT_bd'].T
    z = (adj_bd @ fea) @ params['gcn_w'].T + params['gcn_b_col'].reshape(1, SEQ)
    x = (z + fea) * 0.5                                          # (BND, SEQ)

    g = params['gru']

    def cell(xt, h, off):
        (w_ir, w_iz, w_in, w_hr, w_hz, w_hn,
         b_ir, b_iz, b_in, b_hr, b_hz, b_hn) = [g[off + i] for i in range(12)]
        r = jax.nn.sigmoid(w_ir * xt + b_ir + w_hr * h + b_hr)
        zt = jax.nn.sigmoid(w_iz * xt + b_iz + w_hz * h + b_hz)
        nt = jnp.tanh(w_in * xt + b_in + r * (w_hn * h + b_hn))
        return (1.0 - zt) * nt + zt * h

    h1 = jnp.zeros((BND,), jnp.float32)
    h2 = jnp.zeros((BND,), jnp.float32)
    outs = []
    for t in range(SEQ):
        h1 = cell(x[:, t], h1, 0)
        h2 = cell(h1, h2, 12)
        outs.append(h2)
    hseq = jnp.stack(outs, axis=1)                               # (BND, SEQ)
    y = hseq @ params['fc_w'] + params['fc_b'][0]
    return y.reshape(B, N)


# --------------------------------------------------------------------------------------
# Deterministic parameter / adjacency construction.
# --------------------------------------------------------------------------------------
def init_params(key):
    ks = jax.random.split(key, 8)

    def nrm(k, shape, scale=0.2):
        return (scale * jax.random.normal(k, shape)).astype(jnp.float32)

    p = {}
    p['conv_w'] = nrm(ks[0], (KCNN * 2,))          # flat [w(k,occ), w(k,prc)] per tap
    p['conv_b'] = nrm(ks[1], (1,))
    p['gcn_w'] = nrm(ks[2], (SEQ, SEQ))            # nn.Linear(seq, seq).weight
    p['gcn_b_col'] = nrm(ks[3], (SEQ, 1))          # its bias, column layout (time-major)
    p['gru'] = nrm(ks[4], (NGRU,), scale=0.5)      # 2 layers x (w_ir..b_hn), all scalars
    p['fc_w'] = nrm(ks[5], (SEQ,))                 # nn.Linear(seq, 1).weight
    p['fc_b'] = nrm(ks[6], (1,))

    # TODO(synk): the torch module reads the adjacency from 'SZ247_adj.csv'; here a
    # deterministic ring adjacency with self-loops stands in (kernel math unchanged).
    idx = jnp.arange(N)
    adj = jnp.zeros((N, N), jnp.float32)
    adj = adj.at[idx, idx].set(1.0)
    adj = adj.at[idx, (idx + 1) % N].set(1.0)
    adj = adj.at[idx, (idx - 1) % N].set(1.0)
    # transposed block-diagonal adjacency: folds the per-batch broadcast matmul.
    p['adjT_bd'] = jnp.kron(jnp.eye(B, dtype=jnp.float32), adj).T
    return p


if __name__ == "__main__":
    key = jax.random.PRNGKey(0)
    k_occ, k_prc, k_par = jax.random.split(key, 3)
    occ = jax.random.uniform(k_occ, (B, LOOK_BACK, N), jnp.float32)
    prc_l = jax.random.uniform(k_prc, (B, N), jnp.float32)
    params = init_params(k_par)
    packed = prepare_packed(params)                # one-time weight packing

    y = forward(packed, occ, prc_l)
    y = jax.block_until_ready(y)
    assert y.shape == (B, N) and bool(jnp.all(jnp.isfinite(y)))

    y_ref = forward_ref(params, occ, prc_l)
    err = float(jnp.max(jnp.abs(y - y_ref)))
    # bf16 MXU operands + reordered reductions -> ~1e-3-scale rounding is expected.
    assert err < 1e-2, f"mismatch vs reference: {err}"

    print("KERNEL_OK")
</pallas_src>

<mosaic_0001>
module attributes {stable_mosaic.version = 11 : i64} {
  func.func @tgcn_kernel(%arg0: memref<13xf32, #tpu.memory_space<smem>>, %arg1: memref<12x16xf32, #tpu.memory_space<vmem>>, %arg2: memref<1x16xf32, #tpu.memory_space<vmem>>, %arg3: memref<10x12xf32, #tpu.memory_space<vmem>>, %arg4: memref<16x16xf32, #tpu.memory_space<vmem>>, %arg5: memref<10x11xf32, #tpu.memory_space<vmem>>, %arg6: memref<4x112xf32, #tpu.memory_space<vmem>>, %arg7: memref<1x16xf32, #tpu.memory_space<vmem>>) attributes {dimension_semantics = [], scalar_prefetch = 0 : i64, scratch_operands = 0 : i64, tpu.core_type = #tpu.core_type<tc>} {
    %c0 = arith.constant 0 : index
    %0 = memref.load %arg0[%c0] : memref<13xf32, #tpu.memory_space<smem>>
    %c1 = arith.constant 1 : index
    %1 = memref.load %arg0[%c1] : memref<13xf32, #tpu.memory_space<smem>>
    %c2 = arith.constant 2 : index
    %2 = memref.load %arg0[%c2] : memref<13xf32, #tpu.memory_space<smem>>
    %c3 = arith.constant 3 : index
    %3 = memref.load %arg0[%c3] : memref<13xf32, #tpu.memory_space<smem>>
    %c4 = arith.constant 4 : index
    %4 = memref.load %arg0[%c4] : memref<13xf32, #tpu.memory_space<smem>>
    %c5 = arith.constant 5 : index
    %5 = memref.load %arg0[%c5] : memref<13xf32, #tpu.memory_space<smem>>
    %c6 = arith.constant 6 : index
    %6 = memref.load %arg0[%c6] : memref<13xf32, #tpu.memory_space<smem>>
    %c7 = arith.constant 7 : index
    %7 = memref.load %arg0[%c7] : memref<13xf32, #tpu.memory_space<smem>>
    %c8 = arith.constant 8 : index
    %8 = memref.load %arg0[%c8] : memref<13xf32, #tpu.memory_space<smem>>
    %c9 = arith.constant 9 : index
    %9 = memref.load %arg0[%c9] : memref<13xf32, #tpu.memory_space<smem>>
    %c10 = arith.constant 10 : index
    %10 = memref.load %arg0[%c10] : memref<13xf32, #tpu.memory_space<smem>>
    %c11 = arith.constant 11 : index
    %11 = memref.load %arg0[%c11] : memref<13xf32, #tpu.memory_space<smem>>
    %c12 = arith.constant 12 : index
    %12 = memref.load %arg0[%c12] : memref<13xf32, #tpu.memory_space<smem>>
    %c0_0 = arith.constant 0 : index
    %c0_1 = arith.constant 0 : index
    %13 = vector.load %arg3[%c0_0, %c0_1] : memref<10x12xf32, #tpu.memory_space<vmem>>, vector<10x12xf32>
    %c0_2 = arith.constant 0 : index
    %c0_3 = arith.constant 0 : index
    %14 = vector.load %arg1[%c0_2, %c0_3] : memref<12x16xf32, #tpu.memory_space<vmem>>, vector<12x16xf32>
    %cst = arith.constant dense<0.000000e+00> : vector<10x16xf32>
    %15 = tpu.matmul %13, %14, %cst {dimension_numbers = #tpu.dot_dimension_numbers<[1], [0], [0], [1], [0, 0, 1, 1], [], []>} : vector<10x12xf32>, vector<12x16xf32>, vector<10x16xf32> -> vector<10x16xf32>
    %c0_4 = arith.constant 0 : index
    %c0_5 = arith.constant 0 : index
    %16 = vector.load %arg2[%c0_4, %c0_5] : memref<1x16xf32, #tpu.memory_space<vmem>>, vector<1x16xf32>
    %17 = vector.broadcast %1 : f32 to vector<1x16xf32>
    %18 = arith.mulf %17, %16 : vector<1x16xf32>
    %19 = vector.broadcast %18 : vector<1x16xf32> to vector<10x16xf32>
    %20 = arith.addf %15, %19 : vector<10x16xf32>
    %21 = vector.broadcast %0 : f32 to vector<10x16xf32>
    %22 = arith.addf %20, %21 : vector<10x16xf32>
    %23 = arith.truncf %22 : vector<10x16xf32> to vector<10x16xbf16>
    %c0_6 = arith.constant 0 : index
    %c0_7 = arith.constant 0 : index
    %24 = vector.load %arg4[%c0_6, %c0_7] : memref<16x16xf32, #tpu.memory_space<vmem>>, vector<16x16xf32>
    %25 = arith.truncf %24 : vector<16x16xf32> to vector<16x16xbf16>
    %cst_8 = arith.constant dense<0.000000e+00> : vector<10x16xf32>
    %26 = tpu.matmul %23, %25, %cst_8 {dimension_numbers = #tpu.dot_dimension_numbers<[1], [0], [0], [1], [0, 0, 1, 1], [], []>} : vector<10x16xbf16>, vector<16x16xbf16>, vector<10x16xf32> -> vector<10x16xf32>
    %c0_9 = arith.constant 0 : index
    %c0_10 = arith.constant 0 : index
    %27 = vector.load %arg5[%c0_9, %c0_10] : memref<10x11xf32, #tpu.memory_space<vmem>>, vector<10x10xf32>
    %28 = arith.truncf %27 : vector<10x10xf32> to vector<10x10xbf16>
    %29 = arith.truncf %26 : vector<10x16xf32> to vector<10x16xbf16>
    %cst_11 = arith.constant dense<0.000000e+00> : vector<10x16xf32>
    %30 = tpu.matmul %28, %29, %cst_11 {dimension_numbers = #tpu.dot_dimension_numbers<[1], [0], [0], [1], [0, 0, 1, 1], [], []>} : vector<10x10xbf16>, vector<10x16xbf16>, vector<10x16xf32> -> vector<10x16xf32>
    %c0_12 = arith.constant 0 : index
    %c10_13 = arith.constant 10 : index
    %31 = vector.load %arg5[%c0_12, %c10_13] : memref<10x11xf32, #tpu.memory_space<vmem>>, vector<10x1xf32>
    %32 = vector.broadcast %31 : vector<10x1xf32> to vector<10x16xf32>
    %33 = arith.addf %30, %32 : vector<10x16xf32>
    %34 = arith.addf %33, %22 : vector<10x16xf32>
    %cst_14 = arith.constant 5.000000e-01 : f32
    %35 = vector.broadcast %cst_14 : f32 to vector<10x16xf32>
    %36 = arith.mulf %34, %35 : vector<10x16xf32>
    %c0_15 = arith.constant 0 : index
    %c0_16 = arith.constant 0 : index
    %37 = vector.load %arg6[%c0_15, %c0_16] : memref<4x112xf32, #tpu.memory_space<vmem>>, vector<4x112xf32>
    %38 = vector.extract_strided_slice %37 {offsets = [0, 0], sizes = [4, 16], strides = [1, 1]} : vector<4x112xf32> to vector<4x16xf32>
    %39 = vector.extract_strided_slice %37 {offsets = [0, 16], sizes = [4, 16], strides = [1, 1]} : vector<4x112xf32> to vector<4x16xf32>
    %40 = vector.extract_strided_slice %37 {offsets = [0, 32], sizes = [4, 16], strides = [1, 1]} : vector<4x112xf32> to vector<4x16xf32>
    %41 = vector.extract_strided_slice %37 {offsets = [0, 48], sizes = [2, 16], strides = [1, 1]} : vector<4x112xf32> to vector<2x16xf32>
    %42 = vector.extract_strided_slice %37 {offsets = [0, 64], sizes = [2, 16], strides = [1, 1]} : vector<4x112xf32> to vector<2x16xf32>
    %43 = vector.extract_strided_slice %37 {offsets = [0, 80], sizes = [2, 16], strides = [1, 1]} : vector<4x112xf32> to vector<2x16xf32>
    %44 = vector.extract_strided_slice %37 {offsets = [0, 96], sizes = [2, 16], strides = [1, 1]} : vector<4x112xf32> to vector<2x16xf32>
    %cst_17 = arith.constant 0.000000e+00 : f32
    %45 = vector.broadcast %cst_17 : f32 to vector<2x16xf32>
    %cst_18 = arith.constant 0.000000e+00 : f32
    %46 = vector.broadcast %cst_18 : f32 to vector<1x16xf32>
    %47 = vector.broadcast %2 : f32 to vector<1x16xf32>
    %48 = arith.addf %46, %47 : vector<1x16xf32>
    %49 = vector.extract_strided_slice %36 {offsets = [0, 0], sizes = [1, 16], strides = [1, 1]} : vector<10x16xf32> to vector<1x16xf32>
    %50 = vector.extract_strided_slice %45 {offsets = [0, 0], sizes = [1, 16], strides = [1, 1]} : vector<2x16xf32> to vector<1x16xf32>
    %51 = tpu.concatenate %49, %50 in 0 : vector<1x16xf32>, vector<1x16xf32> -> vector<2x16xf32>
    %52 = tpu.concatenate %51, %51 in 0 : vector<2x16xf32>, vector<2x16xf32> -> vector<4x16xf32>
    %53 = tpu.concatenate %45, %45 in 0 : vector<2x16xf32>, vector<2x16xf32> -> vector<4x16xf32>
    %54 = arith.mulf %38, %52 : vector<4x16xf32>
    %55 = arith.mulf %39, %53 : vector<4x16xf32>
    %56 = arith.addf %54, %55 : vector<4x16xf32>
    %57 = arith.addf %56, %40 : vector<4x16xf32>
    %cst_19 = arith.constant 5.000000e-01 : f32
    %58 = vector.broadcast %cst_19 : f32 to vector<4x16xf32>
    %59 = arith.mulf %58, %57 : vector<4x16xf32>
    %60 = math.tanh %59 : vector<4x16xf32>
    %cst_20 = arith.constant 5.000000e-01 : f32
    %61 = vector.broadcast %cst_20 : f32 to vector<4x16xf32>
    %62 = arith.mulf %61, %60 : vector<4x16xf32>
    %cst_21 = arith.constant 5.000000e-01 : f32
    %63 = vector.broadcast %cst_21 : f32 to vector<4x16xf32>
    %64 = arith.addf %62, %63 : vector<4x16xf32>
    %65 = vector.extract_strided_slice %64 {offsets = [0, 0], sizes = [2, 16], strides = [1, 1]} : vector<4x16xf32> to vector<2x16xf32>
    %66 = vector.extract_strided_slice %64 {offsets = [2, 0], sizes = [2, 16], strides = [1, 1]} : vector<4x16xf32> to vector<2x16xf32>
    %67 = arith.mulf %41, %51 : vector<2x16xf32>
    %68 = arith.addf %67, %43 : vector<2x16xf32>
    %69 = arith.mulf %42, %45 : vector<2x16xf32>
    %70 = arith.addf %69, %44 : vector<2x16xf32>
    %71 = arith.mulf %65, %70 : vector<2x16xf32>
    %72 = arith.addf %68, %71 : vector<2x16xf32>
    %73 = math.tanh %72 : vector<2x16xf32>
    %74 = arith.subf %45, %73 : vector<2x16xf32>
    %75 = arith.mulf %66, %74 : vector<2x16xf32>
    %76 = arith.addf %73, %75 : vector<2x16xf32>
    %77 = vector.extract_strided_slice %76 {offsets = [0, 0], sizes = [1, 16], strides = [1, 1]} : vector<2x16xf32> to vector<1x16xf32>
    %cst_22 = arith.constant 0.000000e+00 : f32
    %78 = vector.broadcast %cst_22 : f32 to vector<1x16xf32>
    %79 = tpu.concatenate %77, %78 in 0 : vector<1x16xf32>, vector<1x16xf32> -> vector<2x16xf32>
    %80 = vector.extract_strided_slice %36 {offsets = [1, 0], sizes = [1, 16], strides = [1, 1]} : vector<10x16xf32> to vector<1x16xf32>
    %81 = vector.extract_strided_slice %79 {offsets = [0, 0], sizes = [1, 16], strides = [1, 1]} : vector<2x16xf32> to vector<1x16xf32>
    %82 = tpu.concatenate %80, %81 in 0 : vector<1x16xf32>, vector<1x16xf32> -> vector<2x16xf32>
    %83 = tpu.concatenate %82, %82 in 0 : vector<2x16xf32>, vector<2x16xf32> -> vector<4x16xf32>
    %84 = tpu.concatenate %79, %79 in 0 : vector<2x16xf32>, vector<2x16xf32> -> vector<4x16xf32>
    %85 = arith.mulf %38, %83 : vector<4x16xf32>
    %86 = arith.mulf %39, %84 : vector<4x16xf32>
    %87 = arith.addf %85, %86 : vector<4x16xf32>
    %88 = arith.addf %87, %40 : vector<4x16xf32>
    %cst_23 = arith.constant 5.000000e-01 : f32
    %89 = vector.broadcast %cst_23 : f32 to vector<4x16xf32>
    %90 = arith.mulf %89, %88 : vector<4x16xf32>
    %91 = math.tanh %90 : vector<4x16xf32>
    %cst_24 = arith.constant 5.000000e-01 : f32
    %92 = vector.broadcast %cst_24 : f32 to vector<4x16xf32>
    %93 = arith.mulf %92, %91 : vector<4x16xf32>
    %cst_25 = arith.constant 5.000000e-01 : f32
    %94 = vector.broadcast %cst_25 : f32 to vector<4x16xf32>
    %95 = arith.addf %93, %94 : vector<4x16xf32>
    %96 = vector.extract_strided_slice %95 {offsets = [0, 0], sizes = [2, 16], strides = [1, 1]} : vector<4x16xf32> to vector<2x16xf32>
    %97 = vector.extract_strided_slice %95 {offsets = [2, 0], sizes = [2, 16], strides = [1, 1]} : vector<4x16xf32> to vector<2x16xf32>
    %98 = arith.mulf %41, %82 : vector<2x16xf32>
    %99 = arith.addf %98, %43 : vector<2x16xf32>
    %100 = arith.mulf %42, %79 : vector<2x16xf32>
    %101 = arith.addf %100, %44 : vector<2x16xf32>
    %102 = arith.mulf %96, %101 : vector<2x16xf32>
    %103 = arith.addf %99, %102 : vector<2x16xf32>
    %104 = math.tanh %103 : vector<2x16xf32>
    %105 = arith.subf %79, %104 : vector<2x16xf32>
    %106 = arith.mulf %97, %105 : vector<2x16xf32>
    %107 = arith.addf %104, %106 : vector<2x16xf32>
    %108 = vector.extract_strided_slice %107 {offsets = [1, 0], sizes = [1, 16], strides = [1, 1]} : vector<2x16xf32> to vector<1x16xf32>
    %109 = vector.broadcast %3 : f32 to vector<1x16xf32>
    %110 = arith.mulf %109, %108 : vector<1x16xf32>
    %111 = arith.addf %48, %110 : vector<1x16xf32>
    %112 = vector.extract_strided_slice %36 {offsets = [2, 0], sizes = [1, 16], strides = [1, 1]} : vector<10x16xf32> to vector<1x16xf32>
    %113 = vector.extract_strided_slice %107 {offsets = [0, 0], sizes = [1, 16], strides = [1, 1]} : vector<2x16xf32> to vector<1x16xf32>
    %114 = tpu.concatenate %112, %113 in 0 : vector<1x16xf32>, vector<1x16xf32> -> vector<2x16xf32>
    %115 = tpu.concatenate %114, %114 in 0 : vector<2x16xf32>, vector<2x16xf32> -> vector<4x16xf32>
    %116 = tpu.concatenate %107, %107 in 0 : vector<2x16xf32>, vector<2x16xf32> -> vector<4x16xf32>
    %117 = arith.mulf %38, %115 : vector<4x16xf32>
    %118 = arith.mulf %39, %116 : vector<4x16xf32>
    %119 = arith.addf %117, %118 : vector<4x16xf32>
    %120 = arith.addf %119, %40 : vector<4x16xf32>
    %cst_26 = arith.constant 5.000000e-01 : f32
    %121 = vector.broadcast %cst_26 : f32 to vector<4x16xf32>
    %122 = arith.mulf %121, %120 : vector<4x16xf32>
    %123 = math.tanh %122 : vector<4x16xf32>
    %cst_27 = arith.constant 5.000000e-01 : f32
    %124 = vector.broadcast %cst_27 : f32 to vector<4x16xf32>
    %125 = arith.mulf %124, %123 : vector<4x16xf32>
    %cst_28 = arith.constant 5.000000e-01 : f32
    %126 = vector.broadcast %cst_28 : f32 to vector<4x16xf32>
    %127 = arith.addf %125, %126 : vector<4x16xf32>
    %128 = vector.extract_strided_slice %127 {offsets = [0, 0], sizes = [2, 16], strides = [1, 1]} : vector<4x16xf32> to vector<2x16xf32>
    %129 = vector.extract_strided_slice %127 {offsets = [2, 0], sizes = [2, 16], strides = [1, 1]} : vector<4x16xf32> to vector<2x16xf32>
    %130 = arith.mulf %41, %114 : vector<2x16xf32>
    %131 = arith.addf %130, %43 : vector<2x16xf32>
    %132 = arith.mulf %42, %107 : vector<2x16xf32>
    %133 = arith.addf %132, %44 : vector<2x16xf32>
    %134 = arith.mulf %128, %133 : vector<2x16xf32>
    %135 = arith.addf %131, %134 : vector<2x16xf32>
    %136 = math.tanh %135 : vector<2x16xf32>
    %137 = arith.subf %107, %136 : vector<2x16xf32>
    %138 = arith.mulf %129, %137 : vector<2x16xf32>
    %139 = arith.addf %136, %138 : vector<2x16xf32>
    %140 = vector.extract_strided_slice %139 {offsets = [1, 0], sizes = [1, 16], strides = [1, 1]} : vector<2x16xf32> to vector<1x16xf32>
    %141 = vector.broadcast %4 : f32 to vector<1x16xf32>
    %142 = arith.mulf %141, %140 : vector<1x16xf32>
    %143 = arith.addf %111, %142 : vector<1x16xf32>
    %144 = vector.extract_strided_slice %36 {offsets = [3, 0], sizes = [1, 16], strides = [1, 1]} : vector<10x16xf32> to vector<1x16xf32>
    %145 = vector.extract_strided_slice %139 {offsets = [0, 0], sizes = [1, 16], strides = [1, 1]} : vector<2x16xf32> to vector<1x16xf32>
    %146 = tpu.concatenate %144, %145 in 0 : vector<1x16xf32>, vector<1x16xf32> -> vector<2x16xf32>
    %147 = tpu.concatenate %146, %146 in 0 : vector<2x16xf32>, vector<2x16xf32> -> vector<4x16xf32>
    %148 = tpu.concatenate %139, %139 in 0 : vector<2x16xf32>, vector<2x16xf32> -> vector<4x16xf32>
    %149 = arith.mulf %38, %147 : vector<4x16xf32>
    %150 = arith.mulf %39, %148 : vector<4x16xf32>
    %151 = arith.addf %149, %150 : vector<4x16xf32>
    %152 = arith.addf %151, %40 : vector<4x16xf32>
    %cst_29 = arith.constant 5.000000e-01 : f32
    %153 = vector.broadcast %cst_29 : f32 to vector<4x16xf32>
    %154 = arith.mulf %153, %152 : vector<4x16xf32>
    %155 = math.tanh %154 : vector<4x16xf32>
    %cst_30 = arith.constant 5.000000e-01 : f32
    %156 = vector.broadcast %cst_30 : f32 to vector<4x16xf32>
    %157 = arith.mulf %156, %155 : vector<4x16xf32>
    %cst_31 = arith.constant 5.000000e-01 : f32
    %158 = vector.broadcast %cst_31 : f32 to vector<4x16xf32>
    %159 = arith.addf %157, %158 : vector<4x16xf32>
    %160 = vector.extract_strided_slice %159 {offsets = [0, 0], sizes = [2, 16], strides = [1, 1]} : vector<4x16xf32> to vector<2x16xf32>
    %161 = vector.extract_strided_slice %159 {offsets = [2, 0], sizes = [2, 16], strides = [1, 1]} : vector<4x16xf32> to vector<2x16xf32>
    %162 = arith.mulf %41, %146 : vector<2x16xf32>
    %163 = arith.addf %162, %43 : vector<2x16xf32>
    %164 = arith.mulf %42, %139 : vector<2x16xf32>
    %165 = arith.addf %164, %44 : vector<2x16xf32>
    %166 = arith.mulf %160, %165 : vector<2x16xf32>
    %167 = arith.addf %163, %166 : vector<2x16xf32>
    %168 = math.tanh %167 : vector<2x16xf32>
    %169 = arith.subf %139, %168 : vector<2x16xf32>
    %170 = arith.mulf %161, %169 : vector<2x16xf32>
    %171 = arith.addf %168, %170 : vector<2x16xf32>
    %172 = vector.extract_strided_slice %171 {offsets = [1, 0], sizes = [1, 16], strides = [1, 1]} : vector<2x16xf32> to vector<1x16xf32>
    %173 = vector.broadcast %5 : f32 to vector<1x16xf32>
    %174 = arith.mulf %173, %172 : vector<1x16xf32>
    %175 = arith.addf %143, %174 : vector<1x16xf32>
    %176 = vector.extract_strided_slice %36 {offsets = [4, 0], sizes = [1, 16], strides = [1, 1]} : vector<10x16xf32> to vector<1x16xf32>
    %177 = vector.extract_strided_slice %171 {offsets = [0, 0], sizes = [1, 16], strides = [1, 1]} : vector<2x16xf32> to vector<1x16xf32>
    %178 = tpu.concatenate %176, %177 in 0 : vector<1x16xf32>, vector<1x16xf32> -> vector<2x16xf32>
    %179 = tpu.concatenate %178, %178 in 0 : vector<2x16xf32>, vector<2x16xf32> -> vector<4x16xf32>
    %180 = tpu.concatenate %171, %171 in 0 : vector<2x16xf32>, vector<2x16xf32> -> vector<4x16xf32>
    %181 = arith.mulf %38, %179 : vector<4x16xf32>
    %182 = arith.mulf %39, %180 : vector<4x16xf32>
    %183 = arith.addf %181, %182 : vector<4x16xf32>
    %184 = arith.addf %183, %40 : vector<4x16xf32>
    %cst_32 = arith.constant 5.000000e-01 : f32
    %185 = vector.broadcast %cst_32 : f32 to vector<4x16xf32>
    %186 = arith.mulf %185, %184 : vector<4x16xf32>
    %187 = math.tanh %186 : vector<4x16xf32>
    %cst_33 = arith.constant 5.000000e-01 : f32
    %188 = vector.broadcast %cst_33 : f32 to vector<4x16xf32>
    %189 = arith.mulf %188, %187 : vector<4x16xf32>
    %cst_34 = arith.constant 5.000000e-01 : f32
    %190 = vector.broadcast %cst_34 : f32 to vector<4x16xf32>
    %191 = arith.addf %189, %190 : vector<4x16xf32>
    %192 = vector.extract_strided_slice %191 {offsets = [0, 0], sizes = [2, 16], strides = [1, 1]} : vector<4x16xf32> to vector<2x16xf32>
    %193 = vector.extract_strided_slice %191 {offsets = [2, 0], sizes = [2, 16], strides = [1, 1]} : vector<4x16xf32> to vector<2x16xf32>
    %194 = arith.mulf %41, %178 : vector<2x16xf32>
    %195 = arith.addf %194, %43 : vector<2x16xf32>
    %196 = arith.mulf %42, %171 : vector<2x16xf32>
    %197 = arith.addf %196, %44 : vector<2x16xf32>
    %198 = arith.mulf %192, %197 : vector<2x16xf32>
    %199 = arith.addf %195, %198 : vector<2x16xf32>
    %200 = math.tanh %199 : vector<2x16xf32>
    %201 = arith.subf %171, %200 : vector<2x16xf32>
    %202 = arith.mulf %193, %201 : vector<2x16xf32>
    %203 = arith.addf %200, %202 : vector<2x16xf32>
    %204 = vector.extract_strided_slice %203 {offsets = [1, 0], sizes = [1, 16], strides = [1, 1]} : vector<2x16xf32> to vector<1x16xf32>
    %205 = vector.broadcast %6 : f32 to vector<1x16xf32>
    %206 = arith.mulf %205, %204 : vector<1x16xf32>
    %207 = arith.addf %175, %206 : vector<1x16xf32>
    %208 = vector.extract_strided_slice %36 {offsets = [5, 0], sizes = [1, 16], strides = [1, 1]} : vector<10x16xf32> to vector<1x16xf32>
    %209 = vector.extract_strided_slice %203 {offsets = [0, 0], sizes = [1, 16], strides = [1, 1]} : vector<2x16xf32> to vector<1x16xf32>
    %210 = tpu.concatenate %208, %209 in 0 : vector<1x16xf32>, vector<1x16xf32> -> vector<2x16xf32>
    %211 = tpu.concatenate %210, %210 in 0 : vector<2x16xf32>, vector<2x16xf32> -> vector<4x16xf32>
    %212 = tpu.concatenate %203, %203 in 0 : vector<2x16xf32>, vector<2x16xf32> -> vector<4x16xf32>
    %213 = arith.mulf %38, %211 : vector<4x16xf32>
    %214 = arith.mulf %39, %212 : vector<4x16xf32>
    %215 = arith.addf %213, %214 : vector<4x16xf32>
    %216 = arith.addf %215, %40 : vector<4x16xf32>
    %cst_35 = arith.constant 5.000000e-01 : f32
    %217 = vector.broadcast %cst_35 : f32 to vector<4x16xf32>
    %218 = arith.mulf %217, %216 : vector<4x16xf32>
    %219 = math.tanh %218 : vector<4x16xf32>
    %cst_36 = arith.constant 5.000000e-01 : f32
    %220 = vector.broadcast %cst_36 : f32 to vector<4x16xf32>
    %221 = arith.mulf %220, %219 : vector<4x16xf32>
    %cst_37 = arith.constant 5.000000e-01 : f32
    %222 = vector.broadcast %cst_37 : f32 to vector<4x16xf32>
    %223 = arith.addf %221, %222 : vector<4x16xf32>
    %224 = vector.extract_strided_slice %223 {offsets = [0, 0], sizes = [2, 16], strides = [1, 1]} : vector<4x16xf32> to vector<2x16xf32>
    %225 = vector.extract_strided_slice %223 {offsets = [2, 0], sizes = [2, 16], strides = [1, 1]} : vector<4x16xf32> to vector<2x16xf32>
    %226 = arith.mulf %41, %210 : vector<2x16xf32>
    %227 = arith.addf %226, %43 : vector<2x16xf32>
    %228 = arith.mulf %42, %203 : vector<2x16xf32>
    %229 = arith.addf %228, %44 : vector<2x16xf32>
    %230 = arith.mulf %224, %229 : vector<2x16xf32>
    %231 = arith.addf %227, %230 : vector<2x16xf32>
    %232 = math.tanh %231 : vector<2x16xf32>
    %233 = arith.subf %203, %232 : vector<2x16xf32>
    %234 = arith.mulf %225, %233 : vector<2x16xf32>
    %235 = arith.addf %232, %234 : vector<2x16xf32>
    %236 = vector.extract_strided_slice %235 {offsets = [1, 0], sizes = [1, 16], strides = [1, 1]} : vector<2x16xf32> to vector<1x16xf32>
    %237 = vector.broadcast %7 : f32 to vector<1x16xf32>
    %238 = arith.mulf %237, %236 : vector<1x16xf32>
    %239 = arith.addf %207, %238 : vector<1x16xf32>
    %240 = vector.extract_strided_slice %36 {offsets = [6, 0], sizes = [1, 16], strides = [1, 1]} : vector<10x16xf32> to vector<1x16xf32>
    %241 = vector.extract_strided_slice %235 {offsets = [0, 0], sizes = [1, 16], strides = [1, 1]} : vector<2x16xf32> to vector<1x16xf32>
    %242 = tpu.concatenate %240, %241 in 0 : vector<1x16xf32>, vector<1x16xf32> -> vector<2x16xf32>
    %243 = tpu.concatenate %242, %242 in 0 : vector<2x16xf32>, vector<2x16xf32> -> vector<4x16xf32>
    %244 = tpu.concatenate %235, %235 in 0 : vector<2x16xf32>, vector<2x16xf32> -> vector<4x16xf32>
    %245 = arith.mulf %38, %243 : vector<4x16xf32>
    %246 = arith.mulf %39, %244 : vector<4x16xf32>
    %247 = arith.addf %245, %246 : vector<4x16xf32>
    %248 = arith.addf %247, %40 : vector<4x16xf32>
    %cst_38 = arith.constant 5.000000e-01 : f32
    %249 = vector.broadcast %cst_38 : f32 to vector<4x16xf32>
    %250 = arith.mulf %249, %248 : vector<4x16xf32>
    %251 = math.tanh %250 : vector<4x16xf32>
    %cst_39 = arith.constant 5.000000e-01 : f32
    %252 = vector.broadcast %cst_39 : f32 to vector<4x16xf32>
    %253 = arith.mulf %252, %251 : vector<4x16xf32>
    %cst_40 = arith.constant 5.000000e-01 : f32
    %254 = vector.broadcast %cst_40 : f32 to vector<4x16xf32>
    %255 = arith.addf %253, %254 : vector<4x16xf32>
    %256 = vector.extract_strided_slice %255 {offsets = [0, 0], sizes = [2, 16], strides = [1, 1]} : vector<4x16xf32> to vector<2x16xf32>
    %257 = vector.extract_strided_slice %255 {offsets = [2, 0], sizes = [2, 16], strides = [1, 1]} : vector<4x16xf32> to vector<2x16xf32>
    %258 = arith.mulf %41, %242 : vector<2x16xf32>
    %259 = arith.addf %258, %43 : vector<2x16xf32>
    %260 = arith.mulf %42, %235 : vector<2x16xf32>
    %261 = arith.addf %260, %44 : vector<2x16xf32>
    %262 = arith.mulf %256, %261 : vector<2x16xf32>
    %263 = arith.addf %259, %262 : vector<2x16xf32>
    %264 = math.tanh %263 : vector<2x16xf32>
    %265 = arith.subf %235, %264 : vector<2x16xf32>
    %266 = arith.mulf %257, %265 : vector<2x16xf32>
    %267 = arith.addf %264, %266 : vector<2x16xf32>
    %268 = vector.extract_strided_slice %267 {offsets = [1, 0], sizes = [1, 16], strides = [1, 1]} : vector<2x16xf32> to vector<1x16xf32>
    %269 = vector.broadcast %8 : f32 to vector<1x16xf32>
    %270 = arith.mulf %269, %268 : vector<1x16xf32>
    %271 = arith.addf %239, %270 : vector<1x16xf32>
    %272 = vector.extract_strided_slice %36 {offsets = [7, 0], sizes = [1, 16], strides = [1, 1]} : vector<10x16xf32> to vector<1x16xf32>
    %273 = vector.extract_strided_slice %267 {offsets = [0, 0], sizes = [1, 16], strides = [1, 1]} : vector<2x16xf32> to vector<1x16xf32>
    %274 = tpu.concatenate %272, %273 in 0 : vector<1x16xf32>, vector<1x16xf32> -> vector<2x16xf32>
    %275 = tpu.concatenate %274, %274 in 0 : vector<2x16xf32>, vector<2x16xf32> -> vector<4x16xf32>
    %276 = tpu.concatenate %267, %267 in 0 : vector<2x16xf32>, vector<2x16xf32> -> vector<4x16xf32>
    %277 = arith.mulf %38, %275 : vector<4x16xf32>
    %278 = arith.mulf %39, %276 : vector<4x16xf32>
    %279 = arith.addf %277, %278 : vector<4x16xf32>
    %280 = arith.addf %279, %40 : vector<4x16xf32>
    %cst_41 = arith.constant 5.000000e-01 : f32
    %281 = vector.broadcast %cst_41 : f32 to vector<4x16xf32>
    %282 = arith.mulf %281, %280 : vector<4x16xf32>
    %283 = math.tanh %282 : vector<4x16xf32>
    %cst_42 = arith.constant 5.000000e-01 : f32
    %284 = vector.broadcast %cst_42 : f32 to vector<4x16xf32>
    %285 = arith.mulf %284, %283 : vector<4x16xf32>
    %cst_43 = arith.constant 5.000000e-01 : f32
    %286 = vector.broadcast %cst_43 : f32 to vector<4x16xf32>
    %287 = arith.addf %285, %286 : vector<4x16xf32>
    %288 = vector.extract_strided_slice %287 {offsets = [0, 0], sizes = [2, 16], strides = [1, 1]} : vector<4x16xf32> to vector<2x16xf32>
    %289 = vector.extract_strided_slice %287 {offsets = [2, 0], sizes = [2, 16], strides = [1, 1]} : vector<4x16xf32> to vector<2x16xf32>
    %290 = arith.mulf %41, %274 : vector<2x16xf32>
    %291 = arith.addf %290, %43 : vector<2x16xf32>
    %292 = arith.mulf %42, %267 : vector<2x16xf32>
    %293 = arith.addf %292, %44 : vector<2x16xf32>
    %294 = arith.mulf %288, %293 : vector<2x16xf32>
    %295 = arith.addf %291, %294 : vector<2x16xf32>
    %296 = math.tanh %295 : vector<2x16xf32>
    %297 = arith.subf %267, %296 : vector<2x16xf32>
    %298 = arith.mulf %289, %297 : vector<2x16xf32>
    %299 = arith.addf %296, %298 : vector<2x16xf32>
    %300 = vector.extract_strided_slice %299 {offsets = [1, 0], sizes = [1, 16], strides = [1, 1]} : vector<2x16xf32> to vector<1x16xf32>
    %301 = vector.broadcast %9 : f32 to vector<1x16xf32>
    %302 = arith.mulf %301, %300 : vector<1x16xf32>
    %303 = arith.addf %271, %302 : vector<1x16xf32>
    %304 = vector.extract_strided_slice %36 {offsets = [8, 0], sizes = [1, 16], strides = [1, 1]} : vector<10x16xf32> to vector<1x16xf32>
    %305 = vector.extract_strided_slice %299 {offsets = [0, 0], sizes = [1, 16], strides = [1, 1]} : vector<2x16xf32> to vector<1x16xf32>
    %306 = tpu.concatenate %304, %305 in 0 : vector<1x16xf32>, vector<1x16xf32> -> vector<2x16xf32>
    %307 = tpu.concatenate %306, %306 in 0 : vector<2x16xf32>, vector<2x16xf32> -> vector<4x16xf32>
    %308 = tpu.concatenate %299, %299 in 0 : vector<2x16xf32>, vector<2x16xf32> -> vector<4x16xf32>
    %309 = arith.mulf %38, %307 : vector<4x16xf32>
    %310 = arith.mulf %39, %308 : vector<4x16xf32>
    %311 = arith.addf %309, %310 : vector<4x16xf32>
    %312 = arith.addf %311, %40 : vector<4x16xf32>
    %cst_44 = arith.constant 5.000000e-01 : f32
    %313 = vector.broadcast %cst_44 : f32 to vector<4x16xf32>
    %314 = arith.mulf %313, %312 : vector<4x16xf32>
    %315 = math.tanh %314 : vector<4x16xf32>
    %cst_45 = arith.constant 5.000000e-01 : f32
    %316 = vector.broadcast %cst_45 : f32 to vector<4x16xf32>
    %317 = arith.mulf %316, %315 : vector<4x16xf32>
    %cst_46 = arith.constant 5.000000e-01 : f32
    %318 = vector.broadcast %cst_46 : f32 to vector<4x16xf32>
    %319 = arith.addf %317, %318 : vector<4x16xf32>
    %320 = vector.extract_strided_slice %319 {offsets = [0, 0], sizes = [2, 16], strides = [1, 1]} : vector<4x16xf32> to vector<2x16xf32>
    %321 = vector.extract_strided_slice %319 {offsets = [2, 0], sizes = [2, 16], strides = [1, 1]} : vector<4x16xf32> to vector<2x16xf32>
    %322 = arith.mulf %41, %306 : vector<2x16xf32>
    %323 = arith.addf %322, %43 : vector<2x16xf32>
    %324 = arith.mulf %42, %299 : vector<2x16xf32>
    %325 = arith.addf %324, %44 : vector<2x16xf32>
    %326 = arith.mulf %320, %325 : vector<2x16xf32>
    %327 = arith.addf %323, %326 : vector<2x16xf32>
    %328 = math.tanh %327 : vector<2x16xf32>
    %329 = arith.subf %299, %328 : vector<2x16xf32>
    %330 = arith.mulf %321, %329 : vector<2x16xf32>
    %331 = arith.addf %328, %330 : vector<2x16xf32>
    %332 = vector.extract_strided_slice %331 {offsets = [1, 0], sizes = [1, 16], strides = [1, 1]} : vector<2x16xf32> to vector<1x16xf32>
    %333 = vector.broadcast %10 : f32 to vector<1x16xf32>
    %334 = arith.mulf %333, %332 : vector<1x16xf32>
    %335 = arith.addf %303, %334 : vector<1x16xf32>
    %336 = vector.extract_strided_slice %36 {offsets = [9, 0], sizes = [1, 16], strides = [1, 1]} : vector<10x16xf32> to vector<1x16xf32>
    %337 = vector.extract_strided_slice %331 {offsets = [0, 0], sizes = [1, 16], strides = [1, 1]} : vector<2x16xf32> to vector<1x16xf32>
    %338 = tpu.concatenate %336, %337 in 0 : vector<1x16xf32>, vector<1x16xf32> -> vector<2x16xf32>
    %339 = tpu.concatenate %338, %338 in 0 : vector<2x16xf32>, vector<2x16xf32> -> vector<4x16xf32>
    %340 = tpu.concatenate %331, %331 in 0 : vector<2x16xf32>, vector<2x16xf32> -> vector<4x16xf32>
    %341 = arith.mulf %38, %339 : vector<4x16xf32>
    %342 = arith.mulf %39, %340 : vector<4x16xf32>
    %343 = arith.addf %341, %342 : vector<4x16xf32>
    %344 = arith.addf %343, %40 : vector<4x16xf32>
    %cst_47 = arith.constant 5.000000e-01 : f32
    %345 = vector.broadcast %cst_47 : f32 to vector<4x16xf32>
    %346 = arith.mulf %345, %344 : vector<4x16xf32>
    %347 = math.tanh %346 : vector<4x16xf32>
    %cst_48 = arith.constant 5.000000e-01 : f32
    %348 = vector.broadcast %cst_48 : f32 to vector<4x16xf32>
    %349 = arith.mulf %348, %347 : vector<4x16xf32>
    %cst_49 = arith.constant 5.000000e-01 : f32
    %350 = vector.broadcast %cst_49 : f32 to vector<4x16xf32>
    %351 = arith.addf %349, %350 : vector<4x16xf32>
    %352 = vector.extract_strided_slice %351 {offsets = [0, 0], sizes = [2, 16], strides = [1, 1]} : vector<4x16xf32> to vector<2x16xf32>
    %353 = vector.extract_strided_slice %351 {offsets = [2, 0], sizes = [2, 16], strides = [1, 1]} : vector<4x16xf32> to vector<2x16xf32>
    %354 = arith.mulf %41, %338 : vector<2x16xf32>
    %355 = arith.addf %354, %43 : vector<2x16xf32>
    %356 = arith.mulf %42, %331 : vector<2x16xf32>
    %357 = arith.addf %356, %44 : vector<2x16xf32>
    %358 = arith.mulf %352, %357 : vector<2x16xf32>
    %359 = arith.addf %355, %358 : vector<2x16xf32>
    %360 = math.tanh %359 : vector<2x16xf32>
    %361 = arith.subf %331, %360 : vector<2x16xf32>
    %362 = arith.mulf %353, %361 : vector<2x16xf32>
    %363 = arith.addf %360, %362 : vector<2x16xf32>
    %364 = vector.extract_strided_slice %363 {offsets = [1, 0], sizes = [1, 16], strides = [1, 1]} : vector<2x16xf32> to vector<1x16xf32>
    %365 = vector.broadcast %11 : f32 to vector<1x16xf32>
    %366 = arith.mulf %365, %364 : vector<1x16xf32>
    %367 = arith.addf %335, %366 : vector<1x16xf32>
    %368 = vector.extract_strided_slice %36 {offsets = [9, 0], sizes = [1, 16], strides = [1, 1]} : vector<10x16xf32> to vector<1x16xf32>
    %369 = vector.extract_strided_slice %363 {offsets = [0, 0], sizes = [1, 16], strides = [1, 1]} : vector<2x16xf32> to vector<1x16xf32>
    %370 = tpu.concatenate %368, %369 in 0 : vector<1x16xf32>, vector<1x16xf32> -> vector<2x16xf32>
    %371 = tpu.concatenate %370, %370 in 0 : vector<2x16xf32>, vector<2x16xf32> -> vector<4x16xf32>
    %372 = tpu.concatenate %363, %363 in 0 : vector<2x16xf32>, vector<2x16xf32> -> vector<4x16xf32>
    %373 = arith.mulf %38, %371 : vector<4x16xf32>
    %374 = arith.mulf %39, %372 : vector<4x16xf32>
    %375 = arith.addf %373, %374 : vector<4x16xf32>
    %376 = arith.addf %375, %40 : vector<4x16xf32>
    %cst_50 = arith.constant 5.000000e-01 : f32
    %377 = vector.broadcast %cst_50 : f32 to vector<4x16xf32>
    %378 = arith.mulf %377, %376 : vector<4x16xf32>
    %379 = math.tanh %378 : vector<4x16xf32>
    %cst_51 = arith.constant 5.000000e-01 : f32
    %380 = vector.broadcast %cst_51 : f32 to vector<4x16xf32>
    %381 = arith.mulf %380, %379 : vector<4x16xf32>
    %cst_52 = arith.constant 5.000000e-01 : f32
    %382 = vector.broadcast %cst_52 : f32 to vector<4x16xf32>
    %383 = arith.addf %381, %382 : vector<4x16xf32>
    %384 = vector.extract_strided_slice %383 {offsets = [0, 0], sizes = [2, 16], strides = [1, 1]} : vector<4x16xf32> to vector<2x16xf32>
    %385 = vector.extract_strided_slice %383 {offsets = [2, 0], sizes = [2, 16], strides = [1, 1]} : vector<4x16xf32> to vector<2x16xf32>
    %386 = arith.mulf %41, %370 : vector<2x16xf32>
    %387 = arith.addf %386, %43 : vector<2x16xf32>
    %388 = arith.mulf %42, %363 : vector<2x16xf32>
    %389 = arith.addf %388, %44 : vector<2x16xf32>
    %390 = arith.mulf %384, %389 : vector<2x16xf32>
    %391 = arith.addf %387, %390 : vector<2x16xf32>
    %392 = math.tanh %391 : vector<2x16xf32>
    %393 = arith.subf %363, %392 : vector<2x16xf32>
    %394 = arith.mulf %385, %393 : vector<2x16xf32>
    %395 = arith.addf %392, %394 : vector<2x16xf32>
    %396 = vector.extract_strided_slice %395 {offsets = [1, 0], sizes = [1, 16], strides = [1, 1]} : vector<2x16xf32> to vector<1x16xf32>
    %397 = vector.broadcast %12 : f32 to vector<1x16xf32>
    %398 = arith.mulf %397, %396 : vector<1x16xf32>
    %399 = arith.addf %367, %398 : vector<1x16xf32>
    %c0_53 = arith.constant 0 : index
    %c0_54 = arith.constant 0 : index
    %400 = vector.load %arg7[%c0_53, %c0_54] : memref<1x16xf32, #tpu.memory_space<vmem>>, vector<1x16xf32>
    tpu.vector_store %arg7[%c0_53, %c0_54], %399 {strides = array<i32>} : memref<1x16xf32, #tpu.memory_space<vmem>>, vector<1x16xf32>,
    return
  }
}

</mosaic_0001>

<bundles_post_ra>
// kernel: run_tgcn.1
= control target key start
LH: loop header
LB: loop body
LE: loop exit
PB: predicated region body
PF: predicated region fallthrough
CT: control target
= control target key end

     0   :  { %12 = vsyncpa [#allocation4], 0  ;;  %s1481_s0 = inlined_call_operand.vmem [shape: f32[13], index: 0, kind: input, shape index: {}]   ;;  %s1482_s1 = inlined_call_operand.vmem [shape: f32[12,16], index: 1, kind: input, shape index: {}]   ;;  %s1483_s2 = inlined_call_operand.vmem [shape: f32[1,16], index: 2, kind: input, shape index: {}]   ;;  %s1484_s3 = inlined_call_operand.vmem [shape: f32[10,12], index: 3, kind: input, shape index: {}]   ;;  %s1485_s4 = inlined_call_operand.vmem [shape: f32[16,16], index: 4, kind: input, shape index: {}]   ;;  %s1486_s5 = inlined_call_operand.hbm [shape: f32[10,11], index: 5, kind: input, shape index: {}]   ;;  %s1487_s6 = inlined_call_operand.hbm [shape: f32[4,112], index: 6, kind: input, shape index: {}]   ;;  %s1488_s7 = inlined_call_operand.vmem [shape: f32[1,16], index: 7, kind: output, shape index: {}]  }
   0x1   :  { %13 = vsyncpa [#allocation3], 0  ;;  %s20_s26 = sshll.u32 %s1481_s0, 4  ;;  %s21_s26 = int_to_ptr.vmem [resolvable:$true] %s20_s26 }
   0x2   :  { %14 = vsyncpa [#allocation7], 0  ;;  %s36_s29 = sshll.u32 %s1486_s5, 4  ;;  %s1091_s30 = smov [#allocation2]   ;;  %s37_s29 = int_to_ptr.hbm [resolvable:$true] %s36_s29 }
   0x3   :  { %23 = dma.vmem_to_smem %s21_s26, 16, %s1091_s30, [#allocation4]  }
   0x4   :  { %s1092_s8 = smov [#allocation5]   ;;  %s1093_s10 = smov 128  }
   0x5   :  { %s38_s9 = sshll.u32 %s1092_s8, 4  ;;  %s1094_s11 = smov 8   ;;  %s39_s9 = int_to_ptr.vmem [resolvable:$true] %s38_s9 }
   0x6   :  { %44 = dma.hbm_to_vmem [thread:$0]  %s37_s29, 256, %s39_s9, [#allocation3], %s1093_s10, %s1093_s10, %s1094_s11  }
   0x7   :  { %s50_s14 = sshll.u32 %s1487_s6, 4  ;;  %s1095_s0 = smov [#allocation6]   ;;  %s51_s14 = int_to_ptr.hbm [resolvable:$true] %s50_s14 }
   0x8   :  { %s52_s15 = sshll.u32 %s1095_s0, 4  ;;  %s53_s15 = int_to_ptr.vmem [resolvable:$true] %s52_s15 }
   0x9   :  { %55 = dma.hbm_to_vmem [thread:$0]  %s51_s14, 64, %s53_s15, [#allocation7]  }
   0xa   :  { %1085 = dma.done.wait [#allocation4], 16  }
   0xb   :  { %1086 = vsyncadd [#allocation4], 4294967280 }
   0xc   :  { %1087 = dma.done.wait [#allocation3], 256  }
   0xd   :  { %1088 = vsyncadd [#allocation3], 4294967040 }
   0xe   :  { %1089 = dma.done.wait [#allocation7], 64  }
   0xf   :  { %1090 = vsyncadd [#allocation7], 4294967232 }
  0x10   :  { %68 = sfence }
  0x11   :  { %v86_v0 = vld [vmem:[%s1482_s1 + $0x8] sm:$0xf]  ;;  %vm100_vm0 = vcmask 1043456   ;;  %v85_v1 = vld [vmem:[%s1482_s1] sm:$0xff]  ;;  %vm93_vm1 = vcmask 97280   ;;  %v1096_v7 = vmov 0.0  }
  0x12   :  { %962 = vmatpush.msk.msra.mxu3 %vm100_vm0, %v86_v0  ;;  %v84_v2 = vld [vmem:[%s1484_s3 + $0x8] sm:$0x3]  ;;  %957 = vmatpush.msk.msra.mxu0 %vm100_vm0, %v86_v0  ;;  %v83_v3 = vld [vmem:[%s1484_s3] sm:$0xff]  ;;  %s1097_s25 = smov 16   ;;  %s945_s26 = sld [smem:[#allocation2 + $0x1]]  ;;  %vm134_vm2 = vcmask 130048  }
  0x13   :  { %v131_v4 = vld [vmem:[%s1485_s4] sm:$0xff]  ;;  %v132_v5 = vld [vmem:[%s1485_s4 + $0x8] sm:$0xff]  ;;  %204 = vrot.lane.b32.xlu0 %v1096_v7, %s1097_s25  ;;  %v1172_v8 = vld [vmem:[#allocation6] sm:$0xf]  ;;  %s1098_s3 = smov 96   ;;  %s70_s4 = sld [smem:[#allocation2]] }
  0x14   :  { %963 = vmatpush.msra.mxu3 %v85_v1  ;;  %119 = vmatpush.msra.mxu0 %v85_v1  ;;  %v133_v6 = vpack.c.bf16 %v132_v5, %v131_v4  ;;  %v87_v9 = vld [vmem:[%s1483_s2] sm:$0x1]  ;;  %v1099_v23 = vmov 10   ;;  %v227_v24 = vmul.f32 0.0, %v1172_v8  ;;  %s1100_s2 = smov 112   ;;  %s1101_s29 = smov 64  }
  0x15   :  { %959 = vmatmul.msk.f32.vlgmr.msra.gmra.mxu3 %vm93_vm1, %v84_v2  ;;  %958 = vmatmul.msk.f32.vlgmr.msra.gmra.mxu0 %vm93_vm1, %v83_v3  ;;  %v152_v22 = vld [vmem:[#allocation5] sm:$0xff]  ;;  %vm170_vm3 = vcmask 1044480   ;;  %v1189_v30 = vld [vmem:[#allocation5 + $0x8] sm:$0x3]  ;;  %vm166_vm4 = vcmask 80896   ;;  %vm195_vm5 = vcmask 1040384  }
  0x16   :  { %145 = vmatpush.bf16.msra.mxu1 %v133_v6  ;;  %977 = vset.pattern.permute.xlu1 %v1099_v23  ;;  %v154_v33 = vpack.c.bf16 %v1189_v30, %v152_v22  ;;  %vm200_vm6 = vcmask 1041408   ;;  %s1102_s30 = smov 48   ;;  %s1103_s8 = smov 80   ;;  %vm936_vm7 = vcmask 123905  }
  0x17   :  { %978 = vset.pattern.permute.xlu2 %v1099_v23  ;;  %158 = vperm.xlu1 %977, %v152_v22   ;;  %s947_s9 = sld [smem:[#allocation2 + $0x3]] }
  0x18   :  { %v88_v10 = vstv %s945_s26  ;;  %979 = vset.pattern.permute.xlu0 %v1099_v23  ;;  %s948_s10 = sld [smem:[#allocation2 + $0x4]] }
  0x19   :  { %v89_v11 = vmul.f32 %v88_v10, %v87_v9  ;;  %v127_v15 = vstv %s70_s4  ;;  %s946_s11 = sld [smem:[#allocation2 + $0x2]] }
  0x1a   :  { %s949_s12 = sld [smem:[#allocation2 + $0x5]] }
  0x1b   :  { %214 = vrot.lane.b32.xlu0 %v1172_v8, %s1098_s3  ;;  %v91_v12 = vperm.slane %v89_v11, 0  ;;  %s950_s13 = sld [smem:[#allocation2 + $0x6]] }
  0x1c   :  { %s951_s14 = sld [smem:[#allocation2 + $0x7]] }
  0x1d   :  { %s952_s0 = sld [smem:[#allocation2 + $0x8]] }
  0x1e   :  { %s953_s15 = sld [smem:[#allocation2 + $0x9]] }
  0x1f   :  { %s954_s5 = sld [smem:[#allocation2 + $0xa]] }
  0x20   :  { %s955_s16 = sld [smem:[#allocation2 + $0xb]] }
  0x21   :  { %s956_s17 = sld [smem:[#allocation2 + $0xc]] }
  0x85   :  { %v205_v21 = vpop.permute.xlu0 %204 }
  0x86   :  { %v207_v25 = vmul.f32 %v205_v21, %v1172_v8 }
  0x88   :  { %209 = vrot.lane.b32.xlu1 %v207_v25, %s1100_s2 }
  0x89   :  { %v159_v34 = vpop.permute.xlu1 %158 }
  0x8d   :  { %v1184_v26 = vpop.permute.xlu0 %214 }
  0x8e   :  { %v228_v27 = vadd.f32 %v227_v24, %v1184_v26 }
  0x90   :  { %230 = vrot.lane.b32.xlu2 %v228_v27, %s1101_s29 }
  0x92   :  { %v121_v13 = vpop.f32.mrf.mxu0 }
  0x93   :  { %v122_v14 = vadd.f32 %v121_v13, %v91_v12 }
  0x95   :  { %v128_v17 = vadd.f32 %v127_v15, %v122_v14 }
  0x98   :  { %v124_v16 = vpop.f32.mrf.mxu3 }
  0x99   :  { %v125_v18 = vadd.f32 %v124_v16, %v91_v12 }
  0x9b   :  { %v1179_v19 = vadd.f32 %v127_v15, %v125_v18 }
  0x9d   :  { %v130_v20 = vpack.c.bf16 %v1179_v19, %v128_v17 }
  0x9f   :  { %960 = vmatmul.msk.bf16.vlgmr.msra.gmra.mxu1 %vm134_vm2, %v130_v20 }
  0xea   :  { %v231_v49 = vpop.permute.xlu2 %230 }
  0xfa   :  { %v210_v41 = vpop.permute.xlu1 %209 }
 0x11c   :  { %v147_v28 = vpop.f32.mrf.mxu1 }
 0x124   :  { %v149_v29 = vpop.f32.mrf.mxu1 }
 0x125   :  { %v155_v31 = vpack.c.bf16 %v149_v29, %v147_v28 }
 0x127   :  { %v172_v32 = vsel %vm170_vm3, %v155_v31, 0 }
 0x128   :  { %181 = vmatpush.bf16.msra.mxu2 %v172_v32 }
 0x12b   :  { %961 = vmatmul.msk.bf16.vlgmr.msra.gmra.mxu2 %vm166_vm4, %v154_v33 }
 0x1ae   :  { %v183_v35 = vpop.f32.mrf.mxu2 }
 0x1af   :  { %v184_v36 = vadd.f32 %v183_v35, %v159_v34 }
 0x1b1   :  { %v188_v37 = vadd.f32 %v184_v36, %v128_v17 }
 0x1b3   :  { %v1192_v38 = vmul.f32 0.5, %v188_v37 }
 0x1b5   :  { %v196_v39 = vsel %vm195_vm5, %v1192_v38, 0.0  ;;  %v255_v5 = vrot.slane %v1192_v38, 1 }
 0x1b6   :  { %222 = vrot.lane.b32.xlu2 %v196_v39, %s1102_s30  ;;  %v198_v40 = vrot.slane %v196_v39, 6 }
 0x1b8   :  { %v201_v42 = vsel %vm200_vm6, %v196_v39, %v198_v40 }
 0x1b9   :  { %v202_v43 = vmul.f32 %v201_v42, %v1172_v8 }
 0x1bb   :  { %v212_v44 = vadd.f32 %v210_v41, %v202_v43 }
 0x1bd   :  { %v217_v45 = vadd.f32 %v1184_v26, %v212_v44 }
 0x1bf   :  { %v218_v46 = vmul.f32 0.5, %v217_v45 }
 0x1c1   :  { %980 = vtanh.f32 %v218_v46  ;;  %v323_v46 = vrot.slane %v1192_v38, 2 }
 0x1c7   :  { %v981_v47 = vpop.eup %980 }
 0x1c8   :  { %v220_v48 = vmul.f32 0.5, %v981_v47 }
 0x1ca   :  { %v221_v50 = vadd.f32 0.5, %v220_v48 }
 0x1cc   :  { %v233_v51 = vmul.f32 %v231_v49, %v221_v50 }
 0x1ce   :  { %235 = vrot.lane.b32.xlu0 %v233_v51, %s1102_s30 }
 0x210   :  { %v223_v52 = vpop.permute.xlu2 %222 }
 0x211   :  { %v225_v53 = vmul.f32 %v223_v52, %v1172_v8 }
 0x213   :  { %v226_v54 = vadd.f32 %v225_v53, %v1184_v26 }
 0x240   :  { %v236_v55 = vpop.permute.xlu0 %235 }
 0x241   :  { %v238_v56 = vadd.f32 %v236_v55, %v226_v54 }
 0x243   :  { %982 = vtanh.f32 %v238_v56 }
 0x249   :  { %v983_v57 = vpop.eup %982 }
 0x24a   :  { %v240_v58 = vsub.f32 0.0, %v983_v57 }
 0x24c   :  { %v242_v59 = vrot.slane %v240_v58, 6 }
 0x24e   :  { %243 = vrot.lane.b32.xlu1 %v242_v59, %s1103_s8 }
 0x2c0   :  { %v244_v60 = vpop.permute.xlu1 %243 }
 0x2c1   :  { %v246_v61 = vmul.f32 %v244_v60, %v221_v50 }
 0x2c3   :  { %v248_v62 = vrot.slane %v246_v61, 2 }
 0x2c5   :  { %249 = vrot.lane.b32.xlu2 %v248_v62, %s1102_s30 }
 0x31f   :  { %v250_v63 = vpop.permute.xlu2 %249 }
 0x320   :  { %v252_v0 = vadd.f32 %v983_v57, %v250_v63 }
 0x322   :  { %v253_v1 = vsel %vm195_vm5, %v252_v0, 0.0 }
 0x323   :  { %291 = vrot.lane.b32.xlu1 %v253_v1, %s1097_s25  ;;  %v258_v2 = vrot.slane %v253_v1, 7  ;;  %v267_v3 = vrot.slane %v253_v1, 6 }
 0x325   :  { %259 = vrot.lane.b32.xlu2 %v258_v2, %s1103_s8  ;;  %v269_v4 = vsel %vm200_vm6, %v253_v1, %v267_v3 }
 0x326   :  { %272 = vrot.lane.b32.xlu0 %v269_v4, %s1098_s3 }
 0x37f   :  { %v260_v6 = vpop.permute.xlu2 %259 }
 0x380   :  { %v262_v7 = vsel %vm195_vm5, %v255_v5, %v260_v6 }
 0x381   :  { %286 = vrot.lane.b32.xlu2 %v262_v7, %s1102_s30  ;;  %v264_v14 = vrot.slane %v262_v7, 6 }
 0x383   :  { %v266_v15 = vsel %vm200_vm6, %v262_v7, %v264_v14 }
 0x384   :  { %v270_v16 = vmul.f32 %v266_v15, %v1172_v8 }
 0x395   :  { %v292_v9 = vpop.permute.xlu1 %291 }
 0x396   :  { %v294_v10 = vmul.f32 %v292_v9, %v1172_v8 }
 0x398   :  { %v295_v11 = vadd.f32 %v294_v10, %v1184_v26  ;;  %v273_v12 = vpop.permute.xlu0 %272 }
 0x399   :  { %v275_v13 = vmul.f32 %v273_v12, %v1172_v8 }
 0x39a   :  { %297 = vrot.lane.b32.xlu1 %v295_v11, %s1101_s29 }
 0x39b   :  { %277 = vrot.lane.b32.xlu0 %v275_v13, %s1100_s2 }
 0x3db   :  { %v287_v28 = vpop.permute.xlu2 %286 }
 0x3dc   :  { %v289_v29 = vmul.f32 %v287_v28, %v1172_v8 }
 0x3de   :  { %v290_v31 = vadd.f32 %v289_v29, %v1184_v26 }
 0x40c   :  { %v298_v25 = vpop.permute.xlu1 %297 }
 0x40d   :  { %v278_v17 = vpop.permute.xlu0 %277 }
 0x40e   :  { %v280_v18 = vadd.f32 %v278_v17, %v270_v16 }
 0x410   :  { %v281_v20 = vadd.f32 %v280_v18, %v1184_v26 }
 0x412   :  { %v282_v21 = vmul.f32 0.5, %v281_v20  ;;  %v391_v20 = vrot.slane %v1192_v38, 3 }
 0x414   :  { %984 = vtanh.f32 %v282_v21 }
 0x41a   :  { %v985_v22 = vpop.eup %984 }
 0x41b   :  { %v284_v23 = vmul.f32 0.5, %v985_v22 }
 0x41d   :  { %v285_v24 = vadd.f32 0.5, %v284_v23 }
 0x41f   :  { %v300_v27 = vmul.f32 %v298_v25, %v285_v24 }
 0x421   :  { %302 = vrot.lane.b32.xlu0 %v300_v27, %s1102_s30 }
 0x493   :  { %v303_v32 = vpop.permute.xlu0 %302 }
 0x494   :  { %v305_v33 = vadd.f32 %v303_v32, %v290_v31 }
 0x496   :  { %986 = vtanh.f32 %v305_v33 }
 0x49c   :  { %v987_v34 = vpop.eup %986 }
 0x49d   :  { %v307_v35 = vsub.f32 %v253_v1, %v987_v34 }
 0x49f   :  { %v309_v36 = vrot.slane %v307_v35, 6 }
 0x4a1   :  { %310 = vrot.lane.b32.xlu1 %v309_v36, %s1103_s8 }
 0x513   :  { %v311_v37 = vpop.permute.xlu1 %310 }
 0x514   :  { %v313_v39 = vmul.f32 %v311_v37, %v285_v24 }
 0x516   :  { %v315_v40 = vrot.slane %v313_v39, 2 }
 0x518   :  { %316 = vrot.lane.b32.xlu2 %v315_v40, %s1102_s30 }
 0x572   :  { %v317_v41 = vpop.permute.xlu2 %316 }
 0x573   :  { %v1226_v42 = vadd.f32 %v987_v34, %v317_v41 }
 0x575   :  { %359 = vrot.lane.b32.xlu1 %v1226_v42, %s1097_s25  ;;  %v326_v43 = vrot.slane %v1226_v42, 7  ;;  %v335_v44 = vrot.slane %v1226_v42, 6 }
 0x577   :  { %327 = vrot.lane.b32.xlu2 %v326_v43, %s1103_s8  ;;  %v337_v45 = vsel %vm200_vm6, %v1226_v42, %v335_v44 }
 0x578   :  { %340 = vrot.lane.b32.xlu0 %v337_v45, %s1098_s3 }
 0x5d1   :  { %v328_v47 = vpop.permute.xlu2 %327 }
 0x5d2   :  { %v330_v48 = vsel %vm195_vm5, %v323_v46, %v328_v47 }
 0x5d3   :  { %354 = vrot.lane.b32.xlu2 %v330_v48, %s1102_s30  ;;  %v332_v54 = vrot.slane %v330_v48, 6 }
 0x5d5   :  { %v334_v55 = vsel %vm200_vm6, %v330_v48, %v332_v54 }
 0x5d6   :  { %v338_v56 = vmul.f32 %v334_v55, %v1172_v8 }
 0x5e7   :  { %v360_v49 = vpop.permute.xlu1 %359 }
 0x5e8   :  { %v362_v50 = vmul.f32 %v360_v49, %v1172_v8 }
 0x5ea   :  { %v363_v51 = vadd.f32 %v362_v50, %v1184_v26  ;;  %v341_v52 = vpop.permute.xlu0 %340 }
 0x5eb   :  { %v343_v53 = vmul.f32 %v341_v52, %v1172_v8 }
 0x5ec   :  { %365 = vrot.lane.b32.xlu1 %v363_v51, %s1101_s29 }
 0x5ed   :  { %345 = vrot.lane.b32.xlu0 %v343_v53, %s1100_s2 }
 0x62d   :  { %v355_v2 = vpop.permute.xlu2 %354 }
 0x62e   :  { %v357_v3 = vmul.f32 %v355_v2, %v1172_v8 }
 0x630   :  { %v358_v4 = vadd.f32 %v357_v3, %v1184_v26 }
 0x65e   :  { %v366_v0 = vpop.permute.xlu1 %365 }
 0x65f   :  { %v346_v57 = vpop.permute.xlu0 %345 }
 0x660   :  { %v348_v58 = vadd.f32 %v346_v57, %v338_v56 }
 0x662   :  { %v349_v59 = vadd.f32 %v348_v58, %v1184_v26 }
 0x664   :  { %v350_v60 = vmul.f32 0.5, %v349_v59 }
 0x666   :  { %988 = vtanh.f32 %v350_v60  ;;  %v459_v60 = vrot.slane %v1192_v38, 4 }
 0x66c   :  { %v989_v61 = vpop.eup %988 }
 0x66d   :  { %v352_v62 = vmul.f32 0.5, %v989_v61 }
 0x66f   :  { %v353_v63 = vadd.f32 0.5, %v352_v62 }
 0x671   :  { %v368_v1 = vmul.f32 %v366_v0, %v353_v63 }
 0x673   :  { %370 = vrot.lane.b32.xlu0 %v368_v1, %s1102_s30 }
 0x6e5   :  { %v371_v5 = vpop.permute.xlu0 %370 }
 0x6e6   :  { %v373_v6 = vadd.f32 %v371_v5, %v358_v4 }
 0x6e8   :  { %990 = vtanh.f32 %v373_v6 }
 0x6ee   :  { %v991_v7 = vpop.eup %990 }
 0x6ef   :  { %v375_v9 = vsub.f32 %v1226_v42, %v991_v7 }
 0x6f1   :  { %v377_v10 = vrot.slane %v375_v9, 6 }
 0x6f3   :  { %378 = vrot.lane.b32.xlu1 %v377_v10, %s1103_s8 }
 0x765   :  { %v379_v11 = vpop.permute.xlu1 %378 }
 0x766   :  { %v381_v12 = vmul.f32 %v379_v11, %v353_v63 }
 0x768   :  { %v383_v13 = vrot.slane %v381_v12, 2 }
 0x76a   :  { %384 = vrot.lane.b32.xlu2 %v383_v13, %s1102_s30 }
 0x7c4   :  { %v385_v14 = vpop.permute.xlu2 %384 }
 0x7c5   :  { %v1253_v15 = vadd.f32 %v991_v7, %v385_v14 }
 0x7c7   :  { %427 = vrot.lane.b32.xlu1 %v1253_v15, %s1097_s25  ;;  %v394_v16 = vrot.slane %v1253_v15, 7  ;;  %v403_v17 = vrot.slane %v1253_v15, 6 }
 0x7c9   :  { %395 = vrot.lane.b32.xlu2 %v394_v16, %s1103_s8  ;;  %v405_v18 = vsel %vm200_vm6, %v1253_v15, %v403_v17 }
 0x7ca   :  { %408 = vrot.lane.b32.xlu0 %v405_v18, %s1098_s3 }
 0x823   :  { %v396_v21 = vpop.permute.xlu2 %395 }
 0x824   :  { %v398_v22 = vsel %vm195_vm5, %v391_v20, %v396_v21 }
 0x825   :  { %422 = vrot.lane.b32.xlu2 %v398_v22, %s1102_s30  ;;  %v400_v29 = vrot.slane %v398_v22, 6 }
 0x827   :  { %v402_v31 = vsel %vm200_vm6, %v398_v22, %v400_v29 }
 0x828   :  { %v406_v32 = vmul.f32 %v402_v31, %v1172_v8 }
 0x839   :  { %v428_v23 = vpop.permute.xlu1 %427 }
 0x83a   :  { %v430_v24 = vmul.f32 %v428_v23, %v1172_v8 }
 0x83c   :  { %v431_v25 = vadd.f32 %v430_v24, %v1184_v26  ;;  %v409_v27 = vpop.permute.xlu0 %408 }
 0x83d   :  { %v411_v28 = vmul.f32 %v409_v27, %v1172_v8 }
 0x83e   :  { %433 = vrot.lane.b32.xlu1 %v431_v25, %s1101_s29 }
 0x83f   :  { %413 = vrot.lane.b32.xlu0 %v411_v28, %s1100_s2 }
 0x87f   :  { %v423_v44 = vpop.permute.xlu2 %422 }
 0x880   :  { %v425_v45 = vmul.f32 %v423_v44, %v1172_v8 }
 0x882   :  { %v426_v46 = vadd.f32 %v425_v45, %v1184_v26 }
 0x8b0   :  { %v434_v41 = vpop.permute.xlu1 %433 }
 0x8b1   :  { %v414_v33 = vpop.permute.xlu0 %413 }
 0x8b2   :  { %v416_v34 = vadd.f32 %v414_v33, %v406_v32 }
 0x8b4   :  { %v417_v35 = vadd.f32 %v416_v34, %v1184_v26 }
 0x8b6   :  { %v418_v36 = vmul.f32 0.5, %v417_v35 }
 0x8b8   :  { %992 = vtanh.f32 %v418_v36 }
 0x8be   :  { %v993_v37 = vpop.eup %992 }
 0x8bf   :  { %v420_v39 = vmul.f32 0.5, %v993_v37  ;;  %v527_v37 = vrot.slane %v1192_v38, 5 }
 0x8c1   :  { %v421_v40 = vadd.f32 0.5, %v420_v39 }
 0x8c3   :  { %v436_v43 = vmul.f32 %v434_v41, %v421_v40 }
 0x8c5   :  { %438 = vrot.lane.b32.xlu0 %v436_v43, %s1102_s30 }
 0x937   :  { %v439_v47 = vpop.permute.xlu0 %438 }
 0x938   :  { %v441_v48 = vadd.f32 %v439_v47, %v426_v46 }
 0x93a   :  { %994 = vtanh.f32 %v441_v48 }
 0x940   :  { %v995_v49 = vpop.eup %994 }
 0x941   :  { %v443_v50 = vsub.f32 %v1253_v15, %v995_v49 }
 0x943   :  { %v445_v51 = vrot.slane %v443_v50, 6 }
 0x945   :  { %446 = vrot.lane.b32.xlu1 %v445_v51, %s1103_s8 }
 0x9b7   :  { %v447_v52 = vpop.permute.xlu1 %446 }
 0x9b8   :  { %v449_v53 = vmul.f32 %v447_v52, %v421_v40 }
 0x9ba   :  { %v451_v54 = vrot.slane %v449_v53, 2 }
 0x9bc   :  { %452 = vrot.lane.b32.xlu2 %v451_v54, %s1102_s30 }
 0xa16   :  { %v453_v55 = vpop.permute.xlu2 %452 }
 0xa17   :  { %v1280_v56 = vadd.f32 %v995_v49, %v453_v55 }
 0xa19   :  { %495 = vrot.lane.b32.xlu1 %v1280_v56, %s1097_s25  ;;  %v462_v57 = vrot.slane %v1280_v56, 7  ;;  %v471_v58 = vrot.slane %v1280_v56, 6 }
 0xa1b   :  { %463 = vrot.lane.b32.xlu2 %v462_v57, %s1103_s8  ;;  %v473_v59 = vsel %vm200_vm6, %v1280_v56, %v471_v58 }
 0xa1c   :  { %476 = vrot.lane.b32.xlu0 %v473_v59, %s1098_s3 }
 0xa75   :  { %v464_v61 = vpop.permute.xlu2 %463 }
 0xa76   :  { %v466_v62 = vsel %vm195_vm5, %v459_v60, %v464_v61 }
 0xa77   :  { %490 = vrot.lane.b32.xlu2 %v466_v62, %s1102_s30  ;;  %v468_v4 = vrot.slane %v466_v62, 6 }
 0xa79   :  { %v470_v5 = vsel %vm200_vm6, %v466_v62, %v468_v4 }
 0xa7a   :  { %v474_v6 = vmul.f32 %v470_v5, %v1172_v8 }
 0xa8b   :  { %v496_v63 = vpop.permute.xlu1 %495 }
 0xa8c   :  { %v498_v0 = vmul.f32 %v496_v63, %v1172_v8 }
 0xa8e   :  { %v499_v1 = vadd.f32 %v498_v0, %v1184_v26  ;;  %v477_v2 = vpop.permute.xlu0 %476 }
 0xa8f   :  { %v479_v3 = vmul.f32 %v477_v2, %v1172_v8 }
 0xa90   :  { %501 = vrot.lane.b32.xlu1 %v499_v1, %s1101_s29 }
 0xa91   :  { %481 = vrot.lane.b32.xlu0 %v479_v3, %s1100_s2 }
 0xad1   :  { %v491_v18 = vpop.permute.xlu2 %490 }
 0xad2   :  { %v493_v20 = vmul.f32 %v491_v18, %v1172_v8 }
 0xad4   :  { %v494_v21 = vadd.f32 %v493_v20, %v1184_v26 }
 0xb02   :  { %v502_v16 = vpop.permute.xlu1 %501 }
 0xb03   :  { %v482_v7 = vpop.permute.xlu0 %481 }
 0xb04   :  { %v484_v9 = vadd.f32 %v482_v7, %v474_v6 }
 0xb06   :  { %v485_v10 = vadd.f32 %v484_v9, %v1184_v26 }
 0xb08   :  { %v486_v11 = vmul.f32 0.5, %v485_v10 }
 0xb0a   :  { %996 = vtanh.f32 %v486_v11 }
 0xb10   :  { %v997_v12 = vpop.eup %996 }
 0xb11   :  { %v488_v13 = vmul.f32 0.5, %v997_v12 }
 0xb13   :  { %v489_v14 = vadd.f32 0.5, %v488_v13  ;;  %v595_v13 = vrot.slane %v1192_v38, 6 }
 0xb15   :  { %v504_v17 = vmul.f32 %v502_v16, %v489_v14 }
 0xb17   :  { %506 = vrot.lane.b32.xlu0 %v504_v17, %s1102_s30 }
 0xb89   :  { %v507_v22 = vpop.permute.xlu0 %506 }
 0xb8a   :  { %v509_v23 = vadd.f32 %v507_v22, %v494_v21 }
 0xb8c   :  { %998 = vtanh.f32 %v509_v23 }
 0xb92   :  { %v999_v24 = vpop.eup %998 }
 0xb93   :  { %v511_v25 = vsub.f32 %v1280_v56, %v999_v24 }
 0xb95   :  { %v513_v27 = vrot.slane %v511_v25, 6 }
 0xb97   :  { %514 = vrot.lane.b32.xlu1 %v513_v27, %s1103_s8 }
 0xc09   :  { %v515_v28 = vpop.permute.xlu1 %514 }
 0xc0a   :  { %v517_v29 = vmul.f32 %v515_v28, %v489_v14 }
 0xc0c   :  { %v519_v31 = vrot.slane %v517_v29, 2 }
 0xc0e   :  { %520 = vrot.lane.b32.xlu2 %v519_v31, %s1102_s30 }
 0xc68   :  { %v521_v32 = vpop.permute.xlu2 %520 }
 0xc69   :  { %v1307_v33 = vadd.f32 %v999_v24, %v521_v32 }
 0xc6b   :  { %563 = vrot.lane.b32.xlu1 %v1307_v33, %s1097_s25  ;;  %v530_v34 = vrot.slane %v1307_v33, 7  ;;  %v539_v35 = vrot.slane %v1307_v33, 6 }
 0xc6d   :  { %531 = vrot.lane.b32.xlu2 %v530_v34, %s1103_s8  ;;  %v541_v36 = vsel %vm200_vm6, %v1307_v33, %v539_v35 }
 0xc6e   :  { %544 = vrot.lane.b32.xlu0 %v541_v36, %s1098_s3 }
 0xcc7   :  { %v532_v39 = vpop.permute.xlu2 %531 }
 0xcc8   :  { %v534_v40 = vsel %vm195_vm5, %v527_v37, %v532_v39 }
 0xcc9   :  { %558 = vrot.lane.b32.xlu2 %v534_v40, %s1102_s30  ;;  %v536_v47 = vrot.slane %v534_v40, 6 }
 0xccb   :  { %v538_v48 = vsel %vm200_vm6, %v534_v40, %v536_v47 }
 0xccc   :  { %v542_v49 = vmul.f32 %v538_v48, %v1172_v8 }
 0xcdd   :  { %v564_v41 = vpop.permute.xlu1 %563 }
 0xcde   :  { %v566_v43 = vmul.f32 %v564_v41, %v1172_v8 }
 0xce0   :  { %v567_v44 = vadd.f32 %v566_v43, %v1184_v26  ;;  %v545_v45 = vpop.permute.xlu0 %544 }
 0xce1   :  { %v547_v46 = vmul.f32 %v545_v45, %v1172_v8 }
 0xce2   :  { %569 = vrot.lane.b32.xlu1 %v567_v44, %s1101_s29 }
 0xce3   :  { %549 = vrot.lane.b32.xlu0 %v547_v46, %s1100_s2 }
 0xd23   :  { %v559_v60 = vpop.permute.xlu2 %558 }
 0xd24   :  { %v561_v61 = vmul.f32 %v559_v60, %v1172_v8 }
 0xd26   :  { %v562_v62 = vadd.f32 %v561_v61, %v1184_v26 }
 0xd54   :  { %v570_v58 = vpop.permute.xlu1 %569 }
 0xd55   :  { %v550_v50 = vpop.permute.xlu0 %549 }
 0xd56   :  { %v552_v51 = vadd.f32 %v550_v50, %v542_v49 }
 0xd58   :  { %v553_v52 = vadd.f32 %v552_v51, %v1184_v26 }
 0xd5a   :  { %v554_v53 = vmul.f32 0.5, %v553_v52 }
 0xd5c   :  { %1000 = vtanh.f32 %v554_v53 }
 0xd62   :  { %v1001_v54 = vpop.eup %1000 }
 0xd63   :  { %v556_v55 = vmul.f32 0.5, %v1001_v54 }
 0xd65   :  { %v557_v57 = vadd.f32 0.5, %v556_v55 }
 0xd67   :  { %v572_v59 = vmul.f32 %v570_v58, %v557_v57 }
 0xd69   :  { %574 = vrot.lane.b32.xlu0 %v572_v59, %s1102_s30 }
 0xddb   :  { %v575_v63 = vpop.permute.xlu0 %574 }
 0xddc   :  { %v577_v0 = vadd.f32 %v575_v63, %v562_v62 }
 0xdde   :  { %1002 = vtanh.f32 %v577_v0 }
 0xde4   :  { %v1003_v1 = vpop.eup %1002 }
 0xde5   :  { %v579_v2 = vsub.f32 %v1307_v33, %v1003_v1 }
 0xde7   :  { %v581_v3 = vrot.slane %v579_v2, 6 }
 0xde9   :  { %582 = vrot.lane.b32.xlu1 %v581_v3, %s1103_s8 }
 0xe5b   :  { %v583_v4 = vpop.permute.xlu1 %582 }
 0xe5c   :  { %v585_v5 = vmul.f32 %v583_v4, %v557_v57  ;;  %v663_v57 = vrot.slane %v1192_v38, 7 }
 0xe5e   :  { %v587_v6 = vrot.slane %v585_v5, 2 }
 0xe60   :  { %588 = vrot.lane.b32.xlu2 %v587_v6, %s1102_s30 }
 0xeba   :  { %v589_v7 = vpop.permute.xlu2 %588 }
 0xebb   :  { %v1334_v9 = vadd.f32 %v1003_v1, %v589_v7 }
 0xebd   :  { %631 = vrot.lane.b32.xlu1 %v1334_v9, %s1097_s25  ;;  %v598_v10 = vrot.slane %v1334_v9, 7  ;;  %v607_v11 = vrot.slane %v1334_v9, 6 }
 0xebf   :  { %599 = vrot.lane.b32.xlu2 %v598_v10, %s1103_s8  ;;  %v609_v12 = vsel %vm200_vm6, %v1334_v9, %v607_v11 }
 0xec0   :  { %612 = vrot.lane.b32.xlu0 %v609_v12, %s1098_s3 }
 0xf19   :  { %v600_v14 = vpop.permute.xlu2 %599 }
 0xf1a   :  { %v602_v16 = vsel %vm195_vm5, %v595_v13, %v600_v14 }
 0xf1b   :  { %626 = vrot.lane.b32.xlu2 %v602_v16, %s1102_s30  ;;  %v604_v23 = vrot.slane %v602_v16, 6 }
 0xf1d   :  { %v606_v24 = vsel %vm200_vm6, %v602_v16, %v604_v23 }
 0xf1e   :  { %v610_v25 = vmul.f32 %v606_v24, %v1172_v8 }
 0xf2f   :  { %v632_v17 = vpop.permute.xlu1 %631 }
 0xf30   :  { %v634_v18 = vmul.f32 %v632_v17, %v1172_v8 }
 0xf32   :  { %v635_v20 = vadd.f32 %v634_v18, %v1184_v26  ;;  %v613_v21 = vpop.permute.xlu0 %612 }
 0xf33   :  { %v615_v22 = vmul.f32 %v613_v21, %v1172_v8 }
 0xf34   :  { %637 = vrot.lane.b32.xlu1 %v635_v20, %s1101_s29 }
 0xf35   :  { %617 = vrot.lane.b32.xlu0 %v615_v22, %s1100_s2 }
 0xf75   :  { %v627_v39 = vpop.permute.xlu2 %626 }
 0xf76   :  { %v629_v40 = vmul.f32 %v627_v39, %v1172_v8 }
 0xf78   :  { %v630_v41 = vadd.f32 %v629_v40, %v1184_v26 }
 0xfa6   :  { %v638_v36 = vpop.permute.xlu1 %637 }
 0xfa7   :  { %v618_v27 = vpop.permute.xlu0 %617 }
 0xfa8   :  { %v620_v28 = vadd.f32 %v618_v27, %v610_v25 }
 0xfaa   :  { %v621_v29 = vadd.f32 %v620_v28, %v1184_v26 }
 0xfac   :  { %v622_v31 = vmul.f32 0.5, %v621_v29 }
 0xfae   :  { %1004 = vtanh.f32 %v622_v31 }
 0xfb4   :  { %v1005_v32 = vpop.eup %1004 }
 0xfb5   :  { %v624_v34 = vmul.f32 0.5, %v1005_v32 }
 0xfb7   :  { %v625_v35 = vadd.f32 0.5, %v624_v34 }
 0xfb9   :  { %v640_v37 = vmul.f32 %v638_v36, %v625_v35 }
 0xfbb   :  { %642 = vrot.lane.b32.xlu0 %v640_v37, %s1102_s30 }
0x102d   :  { %v643_v43 = vpop.permute.xlu0 %642 }
0x102e   :  { %v645_v44 = vadd.f32 %v643_v43, %v630_v41 }
0x1030   :  { %1006 = vtanh.f32 %v645_v44 }
0x1036   :  { %v1007_v45 = vpop.eup %1006 }
0x1037   :  { %v647_v46 = vsub.f32 %v1334_v9, %v1007_v45 }
0x1039   :  { %v649_v47 = vrot.slane %v647_v46, 6 }
0x103b   :  { %650 = vrot.lane.b32.xlu1 %v649_v47, %s1103_s8 }
0x10ad   :  { %v651_v48 = vpop.permute.xlu1 %650 }
0x10ae   :  { %v653_v49 = vmul.f32 %v651_v48, %v625_v35 }
0x10b0   :  { %v655_v50 = vrot.slane %v653_v49, 2 }
0x10b2   :  { %656 = vrot.lane.b32.xlu2 %v655_v50, %s1102_s30 }
0x110c   :  { %v657_v51 = vpop.permute.xlu2 %656 }
0x110d   :  { %v1361_v52 = vadd.f32 %v1007_v45, %v657_v51 }
0x110f   :  { %699 = vrot.lane.b32.xlu1 %v1361_v52, %s1097_s25  ;;  %v666_v53 = vrot.slane %v1361_v52, 7  ;;  %v675_v54 = vrot.slane %v1361_v52, 6 }
0x1111   :  { %667 = vrot.lane.b32.xlu2 %v666_v53, %s1103_s8  ;;  %v677_v55 = vsel %vm200_vm6, %v1361_v52, %v675_v54 }
0x1112   :  { %680 = vrot.lane.b32.xlu0 %v677_v55, %s1098_s3 }
0x116b   :  { %v668_v58 = vpop.permute.xlu2 %667 }
0x116c   :  { %v670_v59 = vsel %vm195_vm5, %v663_v57, %v668_v58 }
0x116d   :  { %694 = vrot.lane.b32.xlu2 %v670_v59, %s1102_s30  ;;  %v672_v1 = vrot.slane %v670_v59, 6 }
0x116f   :  { %v674_v38 = vsel %vm200_vm6, %v670_v59, %v672_v1 }
0x1170   :  { %v678_v2 = vmul.f32 %v674_v38, %v1172_v8 }
0x1181   :  { %v700_v60 = vpop.permute.xlu1 %699 }
0x1182   :  { %v702_v61 = vmul.f32 %v700_v60, %v1172_v8 }
0x1184   :  { %v703_v62 = vadd.f32 %v702_v61, %v1184_v26  ;;  %v681_v63 = vpop.permute.xlu0 %680 }
0x1185   :  { %v683_v0 = vmul.f32 %v681_v63, %v1172_v8 }
0x1186   :  { %705 = vrot.lane.b32.xlu1 %v703_v62, %s1101_s29 }
0x1187   :  { %685 = vrot.lane.b32.xlu0 %v683_v0, %s1100_s2 }
0x11c7   :  { %v695_v14 = vpop.permute.xlu2 %694 }
0x11c8   :  { %v697_v16 = vmul.f32 %v695_v14, %v1172_v8 }
0x11ca   :  { %v698_v17 = vadd.f32 %v697_v16, %v1184_v26 }
0x11f8   :  { %v706_v12 = vpop.permute.xlu1 %705 }
0x11f9   :  { %v686_v3 = vpop.permute.xlu0 %685 }
0x11fa   :  { %v688_v4 = vadd.f32 %v686_v3, %v678_v2 }
0x11fc   :  { %v689_v5 = vadd.f32 %v688_v4, %v1184_v26 }
0x11fe   :  { %v690_v6 = vmul.f32 0.5, %v689_v5 }
0x1200   :  { %1008 = vtanh.f32 %v690_v6 }
0x1206   :  { %v1009_v7 = vpop.eup %1008 }
0x1207   :  { %v692_v10 = vmul.f32 0.5, %v1009_v7 }
0x1209   :  { %v693_v11 = vadd.f32 0.5, %v692_v10 }
0x120b   :  { %v708_v13 = vmul.f32 %v706_v12, %v693_v11 }
0x120d   :  { %710 = vrot.lane.b32.xlu0 %v708_v13, %s1102_s30 }
0x127f   :  { %v711_v18 = vpop.permute.xlu0 %710 }
0x1280   :  { %v713_v20 = vadd.f32 %v711_v18, %v698_v17 }
0x1282   :  { %1010 = vtanh.f32 %v713_v20 }
0x1288   :  { %v1011_v21 = vpop.eup %1010 }
0x1289   :  { %v715_v22 = vsub.f32 %v1361_v52, %v1011_v21 }
0x128b   :  { %v717_v23 = vrot.slane %v715_v22, 6 }
0x128d   :  { %718 = vrot.lane.b32.xlu1 %v717_v23, %s1103_s8 }
0x12ff   :  { %v719_v24 = vpop.permute.xlu1 %718 }
0x1300   :  { %v721_v25 = vmul.f32 %v719_v24, %v693_v11 }
0x1302   :  { %v723_v27 = vrot.slane %v721_v25, 2 }
0x1304   :  { %724 = vrot.lane.b32.xlu2 %v723_v27, %s1102_s30 }
0x130c   :  { %163 = vperm.xlu2 %978, %v1189_v30   ;;  %v185_v30 = vpop.f32.mrf.mxu2 }
0x135e   :  { %v725_v28 = vpop.permute.xlu2 %724 }
0x135f   :  { %v1389_v29 = vadd.f32 %v1011_v21, %v725_v28 }
0x1361   :  { %765 = vrot.lane.b32.xlu1 %v1389_v29, %s1097_s25  ;;  %v741_v31 = vrot.slane %v1389_v29, 6  ;;  %v732_v34 = vrot.slane %v1389_v29, 7 }
0x1363   :  { %v743_v32 = vsel %vm200_vm6, %v1389_v29, %v741_v31 }
0x1364   :  { %746 = vrot.lane.b32.xlu0 %v743_v32, %s1098_s3 }
0x1366   :  { %v164_v35 = vpop.permute.xlu2 %163 }
0x1367   :  { %v186_v39 = vadd.f32 %v185_v30, %v164_v35 }
0x1369   :  { %v189_v44 = vadd.f32 %v186_v39, %v1179_v19 }
0x136b   :  { %v1405_v45 = vmul.f32 0.5, %v189_v44 }
0x136c   :  { %733 = vrot.lane.b32.xlu0 %v732_v34, %s1103_s8 }
0x136d   :  { %v798_v18 = vrot.slane %v1405_v45, 1 }
0x13d3   :  { %v766_v36 = vpop.permute.xlu1 %765 }
0x13d4   :  { %v768_v37 = vmul.f32 %v766_v36, %v1172_v8 }
0x13d6   :  { %v769_v40 = vadd.f32 %v768_v37, %v1184_v26  ;;  %v747_v41 = vpop.permute.xlu0 %746 }
0x13d7   :  { %v749_v43 = vmul.f32 %v747_v41, %v1172_v8 }
0x13d8   :  { %771 = vrot.lane.b32.xlu2 %v769_v40, %s1101_s29 }
0x13d9   :  { %751 = vrot.lane.b32.xlu1 %v749_v43, %s1100_s2 }
0x13de   :  { %v734_v46 = vpop.permute.xlu0 %733 }
0x13df   :  { %v736_v47 = vsel %vm195_vm5, %v1405_v45, %v734_v46 }
0x13e0   :  { %760 = vrot.lane.b32.xlu0 %v736_v47, %s1102_s30  ;;  %v738_v48 = vrot.slane %v736_v47, 6 }
0x13e2   :  { %v740_v49 = vsel %vm200_vm6, %v736_v47, %v738_v48 }
0x13e3   :  { %v744_v50 = vmul.f32 %v740_v49, %v1172_v8 }
0x1432   :  { %v772_v59 = vpop.permute.xlu2 %771 }
0x144b   :  { %v752_v51 = vpop.permute.xlu1 %751 }
0x144c   :  { %v754_v53 = vadd.f32 %v752_v51, %v744_v50 }
0x144e   :  { %v755_v54 = vadd.f32 %v754_v53, %v1184_v26 }
0x1450   :  { %v756_v19 = vmul.f32 0.5, %v755_v54 }
0x1452   :  { %1012 = vtanh.f32 %v756_v19  ;;  %v761_v61 = vpop.permute.xlu0 %760 }
0x1453   :  { %v763_v62 = vmul.f32 %v761_v61, %v1172_v8 }
0x1455   :  { %v764_v63 = vadd.f32 %v763_v62, %v1184_v26 }
0x1458   :  { %v1013_v55 = vpop.eup %1012 }
0x1459   :  { %v758_v57 = vmul.f32 0.5, %v1013_v55 }
0x145b   :  { %v759_v58 = vadd.f32 0.5, %v758_v57 }
0x145d   :  { %v774_v60 = vmul.f32 %v772_v59, %v759_v58 }
0x145f   :  { %776 = vrot.lane.b32.xlu1 %v774_v60, %s1102_s30 }
0x14d1   :  { %v777_v0 = vpop.permute.xlu1 %776 }
0x14d2   :  { %v779_v1 = vadd.f32 %v777_v0, %v764_v63 }
0x14d4   :  { %1014 = vtanh.f32 %v779_v1 }
0x14da   :  { %v1015_v38 = vpop.eup %1014 }
0x14db   :  { %v781_v2 = vsub.f32 %v1389_v29, %v1015_v38 }
0x14dd   :  { %v783_v3 = vrot.slane %v781_v2, 6 }
0x14df   :  { %784 = vrot.lane.b32.xlu2 %v783_v3, %s1103_s8 }
0x1539   :  { %v785_v4 = vpop.permute.xlu2 %784 }
0x153a   :  { %v787_v5 = vmul.f32 %v785_v4, %v759_v58  ;;  %v1024_v58 = vld [vmem:[#allocation6] sm:$0xf] }
0x153c   :  { %v789_v6 = vrot.slane %v787_v5, 2 }
0x153e   :  { %790 = vrot.lane.b32.xlu0 %v789_v6, %s1102_s30 }
0x15b0   :  { %v791_v7 = vpop.permute.xlu0 %790 }
0x15b1   :  { %v1419_v10 = vadd.f32 %v1015_v38, %v791_v7 }
0x15b3   :  { %834 = vrot.lane.b32.xlu2 %v1419_v10, %s1097_s25  ;;  %v801_v11 = vrot.slane %v1419_v10, 7  ;;  %v810_v12 = vrot.slane %v1419_v10, 6 }
0x15b5   :  { %802 = vrot.lane.b32.xlu0 %v801_v11, %s1103_s8  ;;  %v812_v13 = vsel %vm200_vm6, %v1419_v10, %v810_v12 }
0x15b6   :  { %815 = vrot.lane.b32.xlu1 %v812_v13, %s1098_s3 }
0x160d   :  { %v835_v14 = vpop.permute.xlu2 %834 }
0x160e   :  { %v837_v16 = vmul.f32 %v835_v14, %v1172_v8 }
0x1610   :  { %v838_v17 = vadd.f32 %v837_v16, %v1184_v26 }
0x1612   :  { %840 = vrot.lane.b32.xlu2 %v838_v17, %s1101_s29 }
0x1627   :  { %v803_v20 = vpop.permute.xlu0 %802 }
0x1628   :  { %v816_v21 = vpop.permute.xlu1 %815  ;;  %v805_v22 = vsel %vm195_vm5, %v798_v18, %v803_v20 }
0x1629   :  { %v818_v23 = vmul.f32 %v816_v21, %v1172_v8  ;;  %829 = vrot.lane.b32.xlu0 %v805_v22, %s1102_s30  ;;  %v807_v24 = vrot.slane %v805_v22, 6 }
0x162b   :  { %820 = vrot.lane.b32.xlu1 %v818_v23, %s1100_s2  ;;  %v809_v25 = vsel %vm200_vm6, %v805_v22, %v807_v24 }
0x162c   :  { %v813_v27 = vmul.f32 %v809_v25, %v1172_v8 }
0x166c   :  { %v841_v37 = vpop.permute.xlu2 %840 }
0x169b   :  { %v830_v40 = vpop.permute.xlu0 %829 }
0x169c   :  { %v832_v41 = vmul.f32 %v830_v40, %v1172_v8  ;;  %v592_v40 = vstv %s951_s14 }
0x169d   :  { %v821_v28 = vpop.permute.xlu1 %820 }
0x169e   :  { %v823_v31 = vadd.f32 %v821_v28, %v813_v27  ;;  %v833_v43 = vadd.f32 %v832_v41, %v1184_v26 }
0x16a0   :  { %v824_v32 = vadd.f32 %v823_v31, %v1184_v26  ;;  %v388_v31 = vstv %s948_s10 }
0x16a2   :  { %v825_v34 = vmul.f32 0.5, %v824_v32 }
0x16a4   :  { %1016 = vtanh.f32 %v825_v34  ;;  %v193_v34 = vstv %s946_s11 }
0x16aa   :  { %v1017_v35 = vpop.eup %1016 }
0x16ab   :  { %v827_v36 = vmul.f32 0.5, %v1017_v35  ;;  %v456_v35 = vstv %s949_s12 }
0x16ad   :  { %v828_v30 = vadd.f32 0.5, %v827_v36  ;;  %v389_v36 = vmul.f32 %v388_v31, %v1253_v15  ;;  %v794_v15 = vstv %s954_s5 }
0x16af   :  { %v843_v39 = vmul.f32 %v841_v37, %v828_v30 }
0x16b1   :  { %845 = vrot.lane.b32.xlu1 %v843_v39, %s1102_s30  ;;  %v457_v39 = vmul.f32 %v456_v35, %v1280_v56 }
0x1723   :  { %v846_v44 = vpop.permute.xlu1 %845 }
0x1724   :  { %v848_v45 = vadd.f32 %v846_v44, %v833_v43  ;;  %v660_v44 = vstv %s952_s0 }
0x1726   :  { %1018 = vtanh.f32 %v848_v45 }
0x172c   :  { %v1019_v46 = vpop.eup %1018 }
0x172d   :  { %v850_v47 = vsub.f32 %v1419_v10, %v1019_v46 }
0x172f   :  { %v852_v48 = vrot.slane %v850_v47, 6 }
0x1731   :  { %853 = vrot.lane.b32.xlu2 %v852_v48, %s1103_s8  ;;  %v661_v48 = vmul.f32 %v660_v44, %v1361_v52 }
0x178b   :  { %v854_v49 = vpop.permute.xlu2 %853 }
0x178c   :  { %v856_v50 = vmul.f32 %v854_v49, %v828_v30  ;;  %v524_v30 = vstv %s950_s13 }
0x178d   :  { %v525_v43 = vmul.f32 %v524_v30, %v1307_v33 }
0x178e   :  { %v858_v51 = vrot.slane %v856_v50, 2 }
0x1790   :  { %859 = vrot.lane.b32.xlu0 %v858_v51, %s1102_s30  ;;  %v863_v51 = vstv %s955_s16 }
0x1802   :  { %v860_v53 = vpop.permute.xlu0 %859 }
0x1803   :  { %v1446_v54 = vadd.f32 %v1019_v46, %v860_v53  ;;  %v593_v46 = vmul.f32 %v592_v40, %v1334_v9  ;;  %v795_v53 = vmul.f32 %v794_v15, %v1419_v10 }
0x1805   :  { %900 = vrot.lane.b32.xlu2 %v1446_v54, %s1097_s25  ;;  %v867_v8 = vrot.slane %v1446_v54, 7  ;;  %v876_v19 = vrot.slane %v1446_v54, 6  ;;  %v864_v33 = vmul.f32 %v863_v51, %v1446_v54 }
0x1807   :  { %868 = vrot.lane.b32.xlu0 %v867_v8, %s1103_s8  ;;  %v878_v55 = vsel %vm200_vm6, %v1446_v54, %v876_v19  ;;  %v929_v19 = vstv %s956_s17 }
0x1808   :  { %881 = vrot.lane.b32.xlu1 %v878_v55, %s1098_s3 }
0x185f   :  { %v901_v57 = vpop.permute.xlu2 %900 }
0x1860   :  { %v903_v59 = vmul.f32 %v1024_v58, %v901_v57 }
0x1862   :  { %v904_v60 = vadd.f32 %v903_v59, %v1184_v26 }
0x1864   :  { %906 = vrot.lane.b32.xlu2 %v904_v60, %s1101_s29 }
0x1879   :  { %v869_v61 = vpop.permute.xlu0 %868 }
0x187a   :  { %v882_v62 = vpop.permute.xlu1 %881  ;;  %v871_v63 = vsel %vm195_vm5, %v798_v18, %v869_v61 }
0x187b   :  { %v884_v0 = vmul.f32 %v1024_v58, %v882_v62  ;;  %895 = vrot.lane.b32.xlu0 %v871_v63, %s1102_s30  ;;  %v873_v1 = vrot.slane %v871_v63, 6 }
0x187d   :  { %886 = vrot.lane.b32.xlu1 %v884_v0, %s1100_s2  ;;  %v875_v38 = vsel %vm200_vm6, %v871_v63, %v873_v1 }
0x187e   :  { %v879_v2 = vmul.f32 %v1024_v58, %v875_v38 }
0x18be   :  { %v907_v13 = vpop.permute.xlu2 %906 }
0x18ed   :  { %v896_v16 = vpop.permute.xlu0 %895 }
0x18ee   :  { %v898_v17 = vmul.f32 %v1024_v58, %v896_v16 }
0x18ef   :  { %v887_v3 = vpop.permute.xlu1 %886 }
0x18f0   :  { %v889_v4 = vadd.f32 %v887_v3, %v879_v2  ;;  %v899_v18 = vadd.f32 %v898_v17, %v1184_v26 }
0x18f2   :  { %v890_v5 = vadd.f32 %v889_v4, %v1184_v26  ;;  %v320_v26 = vstv %s947_s9 }
0x18f3   :  { %v321_v32 = vmul.f32 %v320_v26, %v1226_v42  ;;  %v728_v42 = vstv %s953_s15 }
0x18f4   :  { %v891_v6 = vmul.f32 0.5, %v890_v5  ;;  %v729_v50 = vmul.f32 %v728_v42, %v1389_v29 }
0x18f5   :  { %v322_v37 = vadd.f32 %v321_v32, %v193_v34 }
0x18f6   :  { %1020 = vtanh.f32 %v891_v6 }
0x18f7   :  { %v390_v41 = vadd.f32 %v389_v36, %v322_v37 }
0x18f9   :  { %v458_v45 = vadd.f32 %v457_v39, %v390_v41 }
0x18fb   :  { %v526_v47 = vadd.f32 %v525_v43, %v458_v45 }
0x18fc   :  { %v1021_v7 = vpop.eup %1020 }
0x18fd   :  { %v893_v11 = vmul.f32 0.5, %v1021_v7  ;;  %v594_v49 = vadd.f32 %v593_v46, %v526_v47 }
0x18ff   :  { %v894_v12 = vadd.f32 0.5, %v893_v11  ;;  %v662_v56 = vadd.f32 %v661_v48, %v594_v49 }
0x1901   :  { %v909_v14 = vmul.f32 %v907_v13, %v894_v12  ;;  %v730_v8 = vadd.f32 %v729_v50, %v662_v56 }
0x1903   :  { %911 = vrot.lane.b32.xlu1 %v909_v14, %s1102_s30  ;;  %v796_v9 = vadd.f32 %v795_v53, %v730_v8 }
0x1905   :  { %v865_v59 = vadd.f32 %v864_v33, %v796_v9 }
0x1975   :  { %v912_v20 = vpop.permute.xlu1 %911 }
0x1976   :  { %v914_v21 = vadd.f32 %v912_v20, %v899_v18 }
0x1978   :  { %1022 = vtanh.f32 %v914_v21 }
0x197e   :  { %v1023_v22 = vpop.eup %1022 }
0x197f   :  { %v916_v23 = vsub.f32 %v1446_v54, %v1023_v22 }
0x1981   :  { %v918_v24 = vrot.slane %v916_v23, 6 }
0x1983   :  { %919 = vrot.lane.b32.xlu2 %v918_v24, %s1103_s8 }
0x19dd   :  { %v920_v25 = vpop.permute.xlu2 %919 }
0x19de   :  { %v922_v27 = vmul.f32 %v920_v25, %v894_v12 }
0x19e0   :  { %v924_v28 = vrot.slane %v922_v27, 2 }
0x19e2   :  { %925 = vrot.lane.b32.xlu0 %v924_v28, %s1102_s30 }
0x1a54   :  { %v926_v55 = vpop.permute.xlu0 %925 }
0x1a55   :  { %v928_v57 = vadd.f32 %v1023_v22, %v926_v55 }
0x1a57   :  { %v930_v58 = vmul.f32 %v929_v19, %v928_v57 }
0x1a59   :  { %v931_v60 = vadd.f32 %v930_v58, %v865_v59 }
0x1a5b   :  { %933 = vrot.lane.b32.xlu1 %v931_v60, %s1103_s8 }
0x1acd   :  { %v934_v52 = vpop.permute.xlu1 %933 }
0x1ace   :  { %937 = vst.msk [vmem:[%s1488_s7 - $0x1] sm:$0x2] %vm936_vm7, %v934_v52 }
0x1acf   :  { %942 = vsyncpa [#allocation3], 1 }
0x1ad0   :  { %943 = vsyncpa [#allocation7], 1 }
0x1ad1   :  { %944 = vsyncpa [#allocation4], 1 }

</bundles_post_ra>
